<compile_context>
chip_gen: v7x
topology: tpu7x:2x2x1
jax: 0.10.0
libtpu: 0.0.40
codegen_flags: <defaults>
</compile_context>

<pallas_src>
import math
import functools

import jax
import jax.numpy as jnp
from jax import lax
from jax.experimental import pallas as pl
from jax.experimental.pallas import tpu as pltpu


# --------------------------------------------------------------------------- #
# Tiling heuristics
# --------------------------------------------------------------------------- #
def _pick_group_size(n_heads, d_k, target=256, max_width=512):
    """Largest head group G (divisor of n_heads) with G*d_k <= max_width,
    stopping as soon as G*d_k reaches the MXU width target."""
    best = 1
    for g in range(1, n_heads + 1):
        if n_heads % g == 0 and g * d_k <= max_width:
            best = g
            if g * d_k >= target:
                break
    return best


def _pick_q_tile(seq_len, target=256):
    """Largest multiple-of-8 divisor of seq_len <= target (or the full length)."""
    if seq_len <= target:
        return seq_len
    best = seq_len                      # fallback: no q tiling
    for t in range(8, target + 1, 8):
        if seq_len % t == 0:
            best = t
    return best


def _vmem_ceiling_bytes():
    """Per-generation VMEM ceiling with headroom (v7x physical is 64 MiB)."""
    try:
        info = pltpu.get_tpu_info()
        cap = getattr(info, "vmem_capacity_bytes", None)
        if cap:
            return int(cap) * 7 // 8
    except Exception:
        pass
    return 56 * (1 << 20)               # safe on v5e / v6e / v7x


def _vmem_limit_bytes(S_q, S_kv, D, TQ, gdk, G, csz, asz):
    MiB = 1 << 20
    f32 = 4
    blocks = 2 * (                      # double-buffered pipeline blocks
        TQ * D * csz                    # q tile
        + 2 * S_kv * D * csz            # k, v (resident per batch row)
        + TQ * S_kv * 2                 # bf16 mask tile
        + 4 * D * gdk * csz             # per-group Wq/Wk/Wv/Wo
        + G * TQ * S_kv * asz           # attention-weights out block
        + TQ * D * f32                  # output tile (f32 accumulator)
    )
    scratch = 2 * S_kv * D * csz        # cached K/V projections, all groups
    temps = (4 * G * TQ * S_kv + 6 * TQ * max(gdk, D) + 2 * S_kv * gdk) * f32
    est = blocks + scratch + temps
    limit = int(est * 1.25) + 8 * MiB
    return int(min(max(limit, 32 * MiB), _vmem_ceiling_bytes()))


# --------------------------------------------------------------------------- #
# Kernel
# --------------------------------------------------------------------------- #
def _mha_kernel(*refs, has_mask, n_group_heads, d_k, scale, compute_dtype):
    """One grid step == one (batch, q_tile, head_group) triple."""
    q_ref, k_ref, v_ref = refs[0:3]
    i = 3
    if has_mask:
        mask_ref = refs[i]
        i += 1
    (wq_ref, bq_ref, wk_ref, bk_ref,
     wv_ref, bv_ref, wo_ref, bo_ref) = refs[i:i + 8]
    out_ref, attn_ref = refs[i + 8:i + 10]
    kg_ref, vg_ref = refs[i + 10:i + 12]

    qi = pl.program_id(1)          # query-tile index
    g = pl.program_id(2)           # head-group index (innermost, "arbitrary")

    def mm(a, b, contract=(1, 0)):
        # MXU matmul; operands already in compute dtype, accumulation in f32.
        return lax.dot_general(
            a, b, (((contract[0],), (contract[1],)), ((), ())),
            preferred_element_type=jnp.float32)

    # ---- K/V projections for this head group: computed once per batch row
    #      (at the first q-tile), cached in VMEM scratch, reused afterwards. --
    @pl.when(qi == 0)
    def _():
        kg_ref[g] = (mm(k_ref[0], wk_ref[0]) + bk_ref[0]).astype(compute_dtype)
        vg_ref[g] = (mm(v_ref[0], wv_ref[0]) + bv_ref[0]).astype(compute_dtype)

    Kg = kg_ref[g]                 # (S_kv, G*d_k)
    Vg = vg_ref[g]                 # (S_kv, G*d_k)

    # ---- Q projection for this q-tile / group; 1/sqrt(d_k) folded once. ----
    Qt = ((mm(q_ref[0], wq_ref[0]) + bq_ref[0]) * scale).astype(compute_dtype)

    if has_mask:
        m = mask_ref[0]            # (TQ, S_kv) bf16; 0 => masked out

    # ---- Per-head scores / softmax / PV (static unroll over the group). ----
    ctx_parts = []
    for hh in range(n_group_heads):
        lo = hh * d_k
        qh = Qt[:, lo:lo + d_k]                         # (TQ, d_k)
        kh = Kg[:, lo:lo + d_k]                         # (S_kv, d_k)
        vh = Vg[:, lo:lo + d_k]                         # (S_kv, d_k)

        s = mm(qh, kh, contract=(1, 1))                 # (TQ, S_kv) f32
        if has_mask:
            # Exact masked_fill(-1e9) semantics (incl. fully-masked rows
            # degrading to uniform weights, matching torch).
            s = jnp.where(m == 0, jnp.float32(-1e9), s)

        s = s - jnp.max(s, axis=-1, keepdims=True)
        e = jnp.exp(s)
        p = e / jnp.sum(e, axis=-1, keepdims=True)      # exact row softmax

        attn_ref[0, hh] = p.astype(attn_ref.dtype)
        ctx_parts.append(mm(p.astype(compute_dtype), vh).astype(compute_dtype))

    # Concatenated group context -> one deep (G*d_k) contraction on the MXU.
    ctx = ctx_parts[0] if n_group_heads == 1 else jnp.concatenate(ctx_parts, -1)
    partial = mm(ctx, wo_ref[0])                        # (TQ, D) f32

    # ---- Output projection accumulated across head groups (g innermost). ---
    @pl.when(g == 0)
    def _():
        out_ref[0] = (partial + bo_ref[...]).astype(out_ref.dtype)

    @pl.when(g > 0)
    def _():
        out_ref[0] = out_ref[0] + partial.astype(out_ref.dtype)


# --------------------------------------------------------------------------- #
# Wrappers
# --------------------------------------------------------------------------- #
def prepare_params(params, n_heads, *, group_size=None,
                   compute_dtype=jnp.bfloat16):
    """One-time weight preprocessing (hoisted out of the hot call path)."""
    wq_t = jnp.asarray(params["wq"], jnp.float32)
    D = wq_t.shape[0]
    assert D % n_heads == 0
    d_k = D // n_heads
    G = group_size if group_size is not None else _pick_group_size(n_heads, d_k)
    assert n_heads % G == 0
    GN = n_heads // G
    gdk = G * d_k

    # PyTorch nn.Linear stores W as (out, in); y = x @ W.T + b.
    def split_in(w):                     # -> (GN, D, G*d_k), compute dtype
        w = jnp.asarray(w, jnp.float32).T
        return w.reshape(D, GN, gdk).transpose(1, 0, 2).astype(compute_dtype)

    def split_bias(b):                   # -> (GN, 1, G*d_k), f32
        return jnp.asarray(b, jnp.float32).reshape(GN, 1, gdk)

    return {
        "wq": split_in(params["wq"]), "bq": split_bias(params["bq"]),
        "wk": split_in(params["wk"]), "bk": split_bias(params["bk"]),
        "wv": split_in(params["wv"]), "bv": split_bias(params["bv"]),
        "wo": jnp.asarray(params["wo"], jnp.float32).T
                 .reshape(GN, gdk, D).astype(compute_dtype),
        "bo": jnp.asarray(params["bo"], jnp.float32).reshape(1, D),
        "n_heads": n_heads, "group_size": G, "d_model": D, "d_k": d_k,
        "compute_dtype": compute_dtype,
    }


def multi_head_attention_with_score(query, key, value, params, n_heads,
                                    mask=None, *, group_size=None, q_tile=None,
                                    compute_dtype=jnp.bfloat16,
                                    attn_dtype=jnp.float32,
                                    prepared_params=None):
    """query: (B,S_q,D); key/value: (B,S_kv,D); mask: optional (B,S_q,S_kv),
    0 => masked.  Returns (output (B,S_q,D) f32, attention_weights
    (B,H,S_q,S_kv) attn_dtype).  Default compute_dtype=bf16 (f32 accumulation);
    pass compute_dtype=jnp.float32 for an exact-parity path."""
    if prepared_params is None:
        prepared_params = prepare_params(params, n_heads,
                                         group_size=group_size,
                                         compute_dtype=compute_dtype)
    pp = prepared_params
    assert pp["n_heads"] == n_heads
    compute_dtype = pp["compute_dtype"]
    G, d_k, D = pp["group_size"], pp["d_k"], pp["d_model"]
    H = n_heads
    GN = H // G
    gdk = G * d_k

    B, S_q, Dq = query.shape
    _, S_kv, _ = key.shape
    assert Dq == D and key.shape == (B, S_kv, D) and value.shape == (B, S_kv, D)

    TQ = q_tile if q_tile is not None else _pick_q_tile(S_q)
    assert S_q % TQ == 0 and (TQ % 8 == 0 or TQ == S_q)
    QT = S_q // TQ

    qc = query.astype(compute_dtype)
    kc = key.astype(compute_dtype)
    vc = value.astype(compute_dtype)

    has_mask = mask is not None
    inputs = [qc, kc, vc]
    in_specs = [
        pl.BlockSpec((1, TQ, D),   lambda b, qi, g: (b, qi, 0)),   # q tile
        pl.BlockSpec((1, S_kv, D), lambda b, qi, g: (b, 0, 0)),    # k
        pl.BlockSpec((1, S_kv, D), lambda b, qi, g: (b, 0, 0)),    # v
    ]
    if has_mask:
        m = (jnp.asarray(mask).reshape(B, S_q, S_kv) != 0).astype(jnp.bfloat16)
        inputs.append(m)
        in_specs.append(pl.BlockSpec((1, TQ, S_kv), lambda b, qi, g: (b, qi, 0)))

    w_spec = pl.BlockSpec((1, D, gdk), lambda b, qi, g: (g, 0, 0))
    b_spec = pl.BlockSpec((1, 1, gdk), lambda b, qi, g: (g, 0, 0))
    inputs += [pp["wq"], pp["bq"], pp["wk"], pp["bk"],
               pp["wv"], pp["bv"], pp["wo"], pp["bo"]]
    in_specs += [w_spec, b_spec, w_spec, b_spec, w_spec, b_spec,
                 pl.BlockSpec((1, gdk, D), lambda b, qi, g: (g, 0, 0)),
                 pl.BlockSpec((1, D),      lambda b, qi, g: (0, 0))]

    kernel = functools.partial(
        _mha_kernel, has_mask=has_mask, n_group_heads=G, d_k=d_k,
        scale=1.0 / math.sqrt(d_k), compute_dtype=compute_dtype)

    csz = jnp.dtype(compute_dtype).itemsize
    asz = jnp.dtype(attn_dtype).itemsize
    vmem_limit = _vmem_limit_bytes(S_q, S_kv, D, TQ, gdk, G, csz, asz)

    out, attn = pl.pallas_call(
        kernel,
        out_shape=(
            jax.ShapeDtypeStruct((B, S_q, D), jnp.float32),
            jax.ShapeDtypeStruct((B, H, S_q, S_kv), attn_dtype),
        ),
        grid_spec=pltpu.PrefetchScalarGridSpec(
            num_scalar_prefetch=0,
            grid=(B, QT, GN),
            in_specs=in_specs,
            out_specs=(
                # output: resident over the head-group axis (accumulator)
                pl.BlockSpec((1, TQ, D), lambda b, qi, g: (b, qi, 0)),
                # attention weights for the G heads of this group / q-tile
                pl.BlockSpec((1, G, TQ, S_kv), lambda b, qi, g: (b, g, qi, 0)),
            ),
            scratch_shapes=[
                pltpu.VMEM((GN, S_kv, gdk), compute_dtype),   # cached K proj
                pltpu.VMEM((GN, S_kv, gdk), compute_dtype),   # cached V proj
            ],
        ),
        compiler_params=pltpu.CompilerParams(
            dimension_semantics=("parallel", "arbitrary", "arbitrary"),
            vmem_limit_bytes=vmem_limit),
    )(*inputs)
    return out, attn


# --------------------------------------------------------------------------- #
# Pure-JAX reference (mirrors the PyTorch forward, eval mode)
# --------------------------------------------------------------------------- #
def _reference(query, key, value, params, n_heads, mask=None):
    B, S, D = query.shape
    d_k = D // n_heads

    def lin(x, w, b):  # PyTorch nn.Linear: y = x W^T + b, w is (out, in)
        return jnp.einsum("bsd,od->bso", x, w) + b

    Q = lin(query, params["wq"], params["bq"]).reshape(B, S, n_heads, d_k).transpose(0, 2, 1, 3)
    K = lin(key, params["wk"], params["bk"]).reshape(B, -1, n_heads, d_k).transpose(0, 2, 1, 3)
    V = lin(value, params["wv"], params["bv"]).reshape(B, -1, n_heads, d_k).transpose(0, 2, 1, 3)
    scores = jnp.einsum("bhqd,bhkd->bhqk", Q, K) / math.sqrt(d_k)
    if mask is not None:
        scores = jnp.where(mask.reshape(B, 1, S, -1) == 0, -1e9, scores)
    attn = jax.nn.softmax(scores, axis=-1)
    ctx = jnp.einsum("bhqk,bhkd->bhqd", attn, V).transpose(0, 2, 1, 3).reshape(B, S, D)
    out = jnp.einsum("bsd,od->bso", ctx, params["wo"]) + params["bo"]
    return out, attn


if __name__ == "__main__":
    B, S, D, H = 2, 8, 32, 4

    key0 = jax.random.PRNGKey(0)
    ks = jax.random.split(key0, 12)
    bound = 1.0 / math.sqrt(D)
    params = {
        "wq": jax.random.uniform(ks[0], (D, D), jnp.float32, -bound, bound),
        "bq": jax.random.uniform(ks[1], (D,), jnp.float32, -bound, bound),
        "wk": jax.random.uniform(ks[2], (D, D), jnp.float32, -bound, bound),
        "bk": jax.random.uniform(ks[3], (D,), jnp.float32, -bound, bound),
        "wv": jax.random.uniform(ks[4], (D, D), jnp.float32, -bound, bound),
        "bv": jax.random.uniform(ks[5], (D,), jnp.float32, -bound, bound),
        "wo": jax.random.uniform(ks[6], (D, D), jnp.float32, -bound, bound),
        "bo": jax.random.uniform(ks[7], (D,), jnp.float32, -bound, bound),
    }

    query = jax.random.normal(ks[8], (B, S, D), jnp.float32)
    key_in = jax.random.normal(ks[9], (B, S, D), jnp.float32)
    value = jax.random.normal(ks[10], (B, S, D), jnp.float32)
    mask = jnp.tril(jnp.ones((S, S), jnp.int32))[None].repeat(B, axis=0)  # causal

    ref_out, ref_attn = _reference(query, key_in, value, params, H, mask=mask)

    # Exact f32 path (parity check: exact softmax divide, no approximations).
    out32, attn32 = multi_head_attention_with_score(
        query, key_in, value, params, H, mask=mask, compute_dtype=jnp.float32)
    jax.block_until_ready((out32, attn32))
    assert out32.shape == (B, S, D) and attn32.shape == (B, H, S, S)
    assert jnp.allclose(out32, ref_out, atol=1e-3, rtol=1e-3)
    assert jnp.allclose(attn32, ref_attn, atol=1e-3, rtol=1e-3)

    # Default bf16 MXU path: weights pre-cast once (hoisted), f32 accumulation.
    prepared = prepare_params(params, H)           # done once at param load
    out_bf, attn_bf = multi_head_attention_with_score(
        query, key_in, value, params, H, mask=mask, prepared_params=prepared)
    jax.block_until_ready((out_bf, attn_bf))
    assert jnp.allclose(out_bf, ref_out, atol=7e-2, rtol=7e-2)
    assert jnp.allclose(attn_bf, ref_attn, atol=7e-2, rtol=7e-2)

    # mask=None path (no mask DMA, no masking work in-kernel).
    ref_out_nm, ref_attn_nm = _reference(query, key_in, value, params, H, mask=None)
    out_nm, attn_nm = multi_head_attention_with_score(
        query, key_in, value, params, H, prepared_params=prepared)
    jax.block_until_ready((out_nm, attn_nm))
    assert jnp.allclose(out_nm, ref_out_nm, atol=7e-2, rtol=7e-2)
    assert jnp.allclose(attn_nm, ref_attn_nm, atol=7e-2, rtol=7e-2)

    print("KERNEL_OK")
</pallas_src>

<mosaic_0001>
module attributes {stable_mosaic.version = 11 : i64} {
  func.func @_mha_kernel(%arg0: i32, %arg1: i32, %arg2: i32, %arg3: memref<1x8x32xf32, #tpu.memory_space<vmem>>, %arg4: memref<1x8x32xf32, #tpu.memory_space<vmem>>, %arg5: memref<1x8x32xf32, #tpu.memory_space<vmem>>, %arg6: memref<1x8x8xbf16, #tpu.memory_space<vmem>>, %arg7: memref<1x32x32xf32, #tpu.memory_space<vmem>>, %arg8: memref<1x1x32xf32, #tpu.memory_space<vmem>>, %arg9: memref<1x32x32xf32, #tpu.memory_space<vmem>>, %arg10: memref<1x1x32xf32, #tpu.memory_space<vmem>>, %arg11: memref<1x32x32xf32, #tpu.memory_space<vmem>>, %arg12: memref<1x1x32xf32, #tpu.memory_space<vmem>>, %arg13: memref<1x32x32xf32, #tpu.memory_space<vmem>>, %arg14: memref<1x32xf32, #tpu.memory_space<vmem>>, %arg15: memref<1x8x32xf32, #tpu.memory_space<vmem>>, %arg16: memref<1x4x8x8xf32, #tpu.memory_space<vmem>>, %arg17: memref<1x8x32xf32, #tpu.memory_space<vmem>>, %arg18: memref<1x8x32xf32, #tpu.memory_space<vmem>>) attributes {dimension_semantics = [#tpu.dimension_semantics<parallel>, #tpu.dimension_semantics<arbitrary>, #tpu.dimension_semantics<arbitrary>], iteration_bounds = array<i64: 2, 1, 1>, scalar_prefetch = 0 : i64, scratch_operands = 2 : i64, tpu.core_type = #tpu.core_type<tc>, window_params = [{transform_indices = @transform_0, window_bounds = array<i64: 1, 8, 32>}, {transform_indices = @transform_1, window_bounds = array<i64: 1, 8, 32>}, {transform_indices = @transform_2, window_bounds = array<i64: 1, 8, 32>}, {transform_indices = @transform_3, window_bounds = array<i64: 1, 8, 8>}, {transform_indices = @transform_4, window_bounds = array<i64: 1, 32, 32>}, {transform_indices = @transform_5, window_bounds = array<i64: 1, 1, 32>}, {transform_indices = @transform_6, window_bounds = array<i64: 1, 32, 32>}, {transform_indices = @transform_7, window_bounds = array<i64: 1, 1, 32>}, {transform_indices = @transform_8, window_bounds = array<i64: 1, 32, 32>}, {transform_indices = @transform_9, window_bounds = array<i64: 1, 1, 32>}, {transform_indices = @transform_10, window_bounds = array<i64: 1, 32, 32>}, {pipeline_mode = #tpu.pipeline_mode<synchronous>, transform_indices = @transform_11, window_bounds = array<i64: 1, 32>}, {transform_indices = @transform_12, window_bounds = array<i64: 1, 8, 32>}, {transform_indices = @transform_13, window_bounds = array<i64: 1, 4, 8, 8>}]} {
    %c0_i32 = arith.constant 0 : i32
    %0 = arith.cmpi eq, %arg1, %c0_i32 : i32
    %1 = arith.extui %0 : i1 to i32
    %c0_i32_0 = arith.constant 0 : i32
    %2 = arith.cmpi ne, %1, %c0_i32_0 : i32
    scf.if %2 {
      %c0_62 = arith.constant 0 : index
      %c0_63 = arith.constant 0 : index
      %c0_64 = arith.constant 0 : index
      %116 = vector.load %arg4[%c0_62, %c0_63, %c0_64] : memref<1x8x32xf32, #tpu.memory_space<vmem>>, vector<1x8x32xf32>
      %117 = vector.shape_cast %116 : vector<1x8x32xf32> to vector<8x32xf32>
      %c0_65 = arith.constant 0 : index
      %c0_66 = arith.constant 0 : index
      %c0_67 = arith.constant 0 : index
      %118 = vector.load %arg9[%c0_65, %c0_66, %c0_67] : memref<1x32x32xf32, #tpu.memory_space<vmem>>, vector<1x32x32xf32>
      %119 = vector.shape_cast %118 : vector<1x32x32xf32> to vector<32x32xf32>
      %cst_68 = arith.constant dense<0.000000e+00> : vector<8x32xf32>
      %120 = tpu.matmul %117, %119, %cst_68 {dimension_numbers = #tpu.dot_dimension_numbers<[1], [0], [0], [1], [0, 0, 1, 1], [], []>} : vector<8x32xf32>, vector<32x32xf32>, vector<8x32xf32> -> vector<8x32xf32>
      %c0_69 = arith.constant 0 : index
      %c0_70 = arith.constant 0 : index
      %c0_71 = arith.constant 0 : index
      %121 = vector.load %arg10[%c0_69, %c0_70, %c0_71] : memref<1x1x32xf32, #tpu.memory_space<vmem>>, vector<1x1x32xf32>
      %122 = vector.shape_cast %121 : vector<1x1x32xf32> to vector<1x32xf32>
      %123 = vector.broadcast %122 : vector<1x32xf32> to vector<8x32xf32>
      %124 = arith.addf %120, %123 : vector<8x32xf32>
      %125 = arith.index_cast %arg2 : i32 to index
      %c0_72 = arith.constant 0 : index
      %c0_73 = arith.constant 0 : index
      %126 = vector.load %arg17[%125, %c0_72, %c0_73] : memref<1x8x32xf32, #tpu.memory_space<vmem>>, vector<1x8x32xf32>
      %127 = vector.shape_cast %126 : vector<1x8x32xf32> to vector<8x32xf32>
      %128 = vector.shape_cast %124 : vector<8x32xf32> to vector<1x8x32xf32>
      tpu.vector_store %arg17[%125, %c0_72, %c0_73], %128 {strides = array<i32>} : memref<1x8x32xf32, #tpu.memory_space<vmem>>, vector<1x8x32xf32>,
      %c0_74 = arith.constant 0 : index
      %c0_75 = arith.constant 0 : index
      %c0_76 = arith.constant 0 : index
      %129 = vector.load %arg5[%c0_74, %c0_75, %c0_76] : memref<1x8x32xf32, #tpu.memory_space<vmem>>, vector<1x8x32xf32>
      %130 = vector.shape_cast %129 : vector<1x8x32xf32> to vector<8x32xf32>
      %c0_77 = arith.constant 0 : index
      %c0_78 = arith.constant 0 : index
      %c0_79 = arith.constant 0 : index
      %131 = vector.load %arg11[%c0_77, %c0_78, %c0_79] : memref<1x32x32xf32, #tpu.memory_space<vmem>>, vector<1x32x32xf32>
      %132 = vector.shape_cast %131 : vector<1x32x32xf32> to vector<32x32xf32>
      %cst_80 = arith.constant dense<0.000000e+00> : vector<8x32xf32>
      %133 = tpu.matmul %130, %132, %cst_80 {dimension_numbers = #tpu.dot_dimension_numbers<[1], [0], [0], [1], [0, 0, 1, 1], [], []>} : vector<8x32xf32>, vector<32x32xf32>, vector<8x32xf32> -> vector<8x32xf32>
      %c0_81 = arith.constant 0 : index
      %c0_82 = arith.constant 0 : index
      %c0_83 = arith.constant 0 : index
      %134 = vector.load %arg12[%c0_81, %c0_82, %c0_83] : memref<1x1x32xf32, #tpu.memory_space<vmem>>, vector<1x1x32xf32>
      %135 = vector.shape_cast %134 : vector<1x1x32xf32> to vector<1x32xf32>
      %136 = vector.broadcast %135 : vector<1x32xf32> to vector<8x32xf32>
      %137 = arith.addf %133, %136 : vector<8x32xf32>
      %138 = arith.index_cast %arg2 : i32 to index
      %c0_84 = arith.constant 0 : index
      %c0_85 = arith.constant 0 : index
      %139 = vector.load %arg18[%138, %c0_84, %c0_85] : memref<1x8x32xf32, #tpu.memory_space<vmem>>, vector<1x8x32xf32>
      %140 = vector.shape_cast %139 : vector<1x8x32xf32> to vector<8x32xf32>
      %141 = vector.shape_cast %137 : vector<8x32xf32> to vector<1x8x32xf32>
      tpu.vector_store %arg18[%138, %c0_84, %c0_85], %141 {strides = array<i32>} : memref<1x8x32xf32, #tpu.memory_space<vmem>>, vector<1x8x32xf32>,
    } else {
    }
    %3 = arith.index_cast %arg2 : i32 to index
    %c0 = arith.constant 0 : index
    %c0_1 = arith.constant 0 : index
    %4 = vector.load %arg17[%3, %c0, %c0_1] : memref<1x8x32xf32, #tpu.memory_space<vmem>>, vector<1x8x32xf32>
    %5 = vector.shape_cast %4 : vector<1x8x32xf32> to vector<8x32xf32>
    %6 = arith.index_cast %arg2 : i32 to index
    %c0_2 = arith.constant 0 : index
    %c0_3 = arith.constant 0 : index
    %7 = vector.load %arg18[%6, %c0_2, %c0_3] : memref<1x8x32xf32, #tpu.memory_space<vmem>>, vector<1x8x32xf32>
    %8 = vector.shape_cast %7 : vector<1x8x32xf32> to vector<8x32xf32>
    %c0_4 = arith.constant 0 : index
    %c0_5 = arith.constant 0 : index
    %c0_6 = arith.constant 0 : index
    %9 = vector.load %arg3[%c0_4, %c0_5, %c0_6] : memref<1x8x32xf32, #tpu.memory_space<vmem>>, vector<1x8x32xf32>
    %10 = vector.shape_cast %9 : vector<1x8x32xf32> to vector<8x32xf32>
    %c0_7 = arith.constant 0 : index
    %c0_8 = arith.constant 0 : index
    %c0_9 = arith.constant 0 : index
    %11 = vector.load %arg7[%c0_7, %c0_8, %c0_9] : memref<1x32x32xf32, #tpu.memory_space<vmem>>, vector<1x32x32xf32>
    %12 = vector.shape_cast %11 : vector<1x32x32xf32> to vector<32x32xf32>
    %cst = arith.constant dense<0.000000e+00> : vector<8x32xf32>
    %13 = tpu.matmul %10, %12, %cst {dimension_numbers = #tpu.dot_dimension_numbers<[1], [0], [0], [1], [0, 0, 1, 1], [], []>} : vector<8x32xf32>, vector<32x32xf32>, vector<8x32xf32> -> vector<8x32xf32>
    %c0_10 = arith.constant 0 : index
    %c0_11 = arith.constant 0 : index
    %c0_12 = arith.constant 0 : index
    %14 = vector.load %arg8[%c0_10, %c0_11, %c0_12] : memref<1x1x32xf32, #tpu.memory_space<vmem>>, vector<1x1x32xf32>
    %15 = vector.shape_cast %14 : vector<1x1x32xf32> to vector<1x32xf32>
    %16 = vector.broadcast %15 : vector<1x32xf32> to vector<8x32xf32>
    %17 = arith.addf %13, %16 : vector<8x32xf32>
    %cst_13 = arith.constant 0.353553385 : f32
    %18 = vector.broadcast %cst_13 : f32 to vector<8x32xf32>
    %19 = arith.mulf %17, %18 : vector<8x32xf32>
    %c0_14 = arith.constant 0 : index
    %c0_15 = arith.constant 0 : index
    %c0_16 = arith.constant 0 : index
    %20 = vector.load %arg6[%c0_14, %c0_15, %c0_16] : memref<1x8x8xbf16, #tpu.memory_space<vmem>>, vector<1x8x8xbf16>
    %21 = vector.shape_cast %20 : vector<1x8x8xbf16> to vector<8x8xbf16>
    %22 = vector.extract_strided_slice %19 {offsets = [0, 0], sizes = [8, 8], strides = [1, 1]} : vector<8x32xf32> to vector<8x8xf32>
    %23 = vector.extract_strided_slice %5 {offsets = [0, 0], sizes = [8, 8], strides = [1, 1]} : vector<8x32xf32> to vector<8x8xf32>
    %24 = vector.extract_strided_slice %8 {offsets = [0, 0], sizes = [8, 8], strides = [1, 1]} : vector<8x32xf32> to vector<8x8xf32>
    %cst_17 = arith.constant dense<0.000000e+00> : vector<8x8xf32>
    %25 = tpu.matmul %22, %23, %cst_17 {dimension_numbers = #tpu.dot_dimension_numbers<[1], [1], [0], [0], [0, 0, 1, 0], [], []>} : vector<8x8xf32>, vector<8x8xf32>, vector<8x8xf32> -> vector<8x8xf32>
    %cst_18 = arith.constant 0.000000e+00 : bf16
    %26 = vector.broadcast %cst_18 : bf16 to vector<8x8xbf16>
    %27 = arith.cmpf oeq, %21, %26 : vector<8x8xbf16>
    %cst_19 = arith.constant -1.000000e+09 : f32
    %28 = vector.broadcast %cst_19 : f32 to vector<8x8xf32>
    %29 = arith.select %27, %28, %25 : vector<8x8xi1>, vector<8x8xf32>
    %cst_20 = arith.constant dense<0xFF800000> : vector<8xf32>
    %30 = vector.multi_reduction <maximumf>, %29, %cst_20 [1] : vector<8x8xf32> to vector<8xf32>
    %31 = vector.shape_cast %30 : vector<8xf32> to vector<8x1xf32>
    %32 = vector.broadcast %31 : vector<8x1xf32> to vector<8x8xf32>
    %33 = arith.subf %29, %32 : vector<8x8xf32>
    %34 = math.exp %33 : vector<8x8xf32>
    %cst_21 = arith.constant dense<0.000000e+00> : vector<8xf32>
    %35 = vector.multi_reduction <add>, %34, %cst_21 [1] : vector<8x8xf32> to vector<8xf32>
    %36 = vector.shape_cast %35 : vector<8xf32> to vector<8x1xf32>
    %37 = vector.broadcast %36 : vector<8x1xf32> to vector<8x8xf32>
    %38 = arith.divf %34, %37 : vector<8x8xf32>
    %c0_22 = arith.constant 0 : index
    %c0_23 = arith.constant 0 : index
    %c0_24 = arith.constant 0 : index
    %c0_25 = arith.constant 0 : index
    %39 = vector.load %arg16[%c0_22, %c0_23, %c0_24, %c0_25] : memref<1x4x8x8xf32, #tpu.memory_space<vmem>>, vector<1x1x8x8xf32>
    %40 = vector.shape_cast %39 : vector<1x1x8x8xf32> to vector<8x8xf32>
    %41 = vector.shape_cast %38 : vector<8x8xf32> to vector<1x1x8x8xf32>
    tpu.vector_store %arg16[%c0_22, %c0_23, %c0_24, %c0_25], %41 {strides = array<i32>} : memref<1x4x8x8xf32, #tpu.memory_space<vmem>>, vector<1x1x8x8xf32>,
    %cst_26 = arith.constant dense<0.000000e+00> : vector<8x8xf32>
    %42 = tpu.matmul %38, %24, %cst_26 {dimension_numbers = #tpu.dot_dimension_numbers<[1], [0], [0], [1], [0, 0, 1, 1], [], []>} : vector<8x8xf32>, vector<8x8xf32>, vector<8x8xf32> -> vector<8x8xf32>
    %43 = vector.extract_strided_slice %19 {offsets = [0, 8], sizes = [8, 8], strides = [1, 1]} : vector<8x32xf32> to vector<8x8xf32>
    %44 = vector.extract_strided_slice %5 {offsets = [0, 8], sizes = [8, 8], strides = [1, 1]} : vector<8x32xf32> to vector<8x8xf32>
    %45 = vector.extract_strided_slice %8 {offsets = [0, 8], sizes = [8, 8], strides = [1, 1]} : vector<8x32xf32> to vector<8x8xf32>
    %cst_27 = arith.constant dense<0.000000e+00> : vector<8x8xf32>
    %46 = tpu.matmul %43, %44, %cst_27 {dimension_numbers = #tpu.dot_dimension_numbers<[1], [1], [0], [0], [0, 0, 1, 0], [], []>} : vector<8x8xf32>, vector<8x8xf32>, vector<8x8xf32> -> vector<8x8xf32>
    %cst_28 = arith.constant 0.000000e+00 : bf16
    %47 = vector.broadcast %cst_28 : bf16 to vector<8x8xbf16>
    %48 = arith.cmpf oeq, %21, %47 : vector<8x8xbf16>
    %cst_29 = arith.constant -1.000000e+09 : f32
    %49 = vector.broadcast %cst_29 : f32 to vector<8x8xf32>
    %50 = arith.select %48, %49, %46 : vector<8x8xi1>, vector<8x8xf32>
    %cst_30 = arith.constant dense<0xFF800000> : vector<8xf32>
    %51 = vector.multi_reduction <maximumf>, %50, %cst_30 [1] : vector<8x8xf32> to vector<8xf32>
    %52 = vector.shape_cast %51 : vector<8xf32> to vector<8x1xf32>
    %53 = vector.broadcast %52 : vector<8x1xf32> to vector<8x8xf32>
    %54 = arith.subf %50, %53 : vector<8x8xf32>
    %55 = math.exp %54 : vector<8x8xf32>
    %cst_31 = arith.constant dense<0.000000e+00> : vector<8xf32>
    %56 = vector.multi_reduction <add>, %55, %cst_31 [1] : vector<8x8xf32> to vector<8xf32>
    %57 = vector.shape_cast %56 : vector<8xf32> to vector<8x1xf32>
    %58 = vector.broadcast %57 : vector<8x1xf32> to vector<8x8xf32>
    %59 = arith.divf %55, %58 : vector<8x8xf32>
    %c0_32 = arith.constant 0 : index
    %c1 = arith.constant 1 : index
    %c0_33 = arith.constant 0 : index
    %c0_34 = arith.constant 0 : index
    %60 = vector.load %arg16[%c0_32, %c1, %c0_33, %c0_34] : memref<1x4x8x8xf32, #tpu.memory_space<vmem>>, vector<1x1x8x8xf32>
    %61 = vector.shape_cast %60 : vector<1x1x8x8xf32> to vector<8x8xf32>
    %62 = vector.shape_cast %59 : vector<8x8xf32> to vector<1x1x8x8xf32>
    tpu.vector_store %arg16[%c0_32, %c1, %c0_33, %c0_34], %62 {strides = array<i32>} : memref<1x4x8x8xf32, #tpu.memory_space<vmem>>, vector<1x1x8x8xf32>,
    %cst_35 = arith.constant dense<0.000000e+00> : vector<8x8xf32>
    %63 = tpu.matmul %59, %45, %cst_35 {dimension_numbers = #tpu.dot_dimension_numbers<[1], [0], [0], [1], [0, 0, 1, 1], [], []>} : vector<8x8xf32>, vector<8x8xf32>, vector<8x8xf32> -> vector<8x8xf32>
    %64 = vector.extract_strided_slice %19 {offsets = [0, 16], sizes = [8, 8], strides = [1, 1]} : vector<8x32xf32> to vector<8x8xf32>
    %65 = vector.extract_strided_slice %5 {offsets = [0, 16], sizes = [8, 8], strides = [1, 1]} : vector<8x32xf32> to vector<8x8xf32>
    %66 = vector.extract_strided_slice %8 {offsets = [0, 16], sizes = [8, 8], strides = [1, 1]} : vector<8x32xf32> to vector<8x8xf32>
    %cst_36 = arith.constant dense<0.000000e+00> : vector<8x8xf32>
    %67 = tpu.matmul %64, %65, %cst_36 {dimension_numbers = #tpu.dot_dimension_numbers<[1], [1], [0], [0], [0, 0, 1, 0], [], []>} : vector<8x8xf32>, vector<8x8xf32>, vector<8x8xf32> -> vector<8x8xf32>
    %cst_37 = arith.constant 0.000000e+00 : bf16
    %68 = vector.broadcast %cst_37 : bf16 to vector<8x8xbf16>
    %69 = arith.cmpf oeq, %21, %68 : vector<8x8xbf16>
    %cst_38 = arith.constant -1.000000e+09 : f32
    %70 = vector.broadcast %cst_38 : f32 to vector<8x8xf32>
    %71 = arith.select %69, %70, %67 : vector<8x8xi1>, vector<8x8xf32>
    %cst_39 = arith.constant dense<0xFF800000> : vector<8xf32>
    %72 = vector.multi_reduction <maximumf>, %71, %cst_39 [1] : vector<8x8xf32> to vector<8xf32>
    %73 = vector.shape_cast %72 : vector<8xf32> to vector<8x1xf32>
    %74 = vector.broadcast %73 : vector<8x1xf32> to vector<8x8xf32>
    %75 = arith.subf %71, %74 : vector<8x8xf32>
    %76 = math.exp %75 : vector<8x8xf32>
    %cst_40 = arith.constant dense<0.000000e+00> : vector<8xf32>
    %77 = vector.multi_reduction <add>, %76, %cst_40 [1] : vector<8x8xf32> to vector<8xf32>
    %78 = vector.shape_cast %77 : vector<8xf32> to vector<8x1xf32>
    %79 = vector.broadcast %78 : vector<8x1xf32> to vector<8x8xf32>
    %80 = arith.divf %76, %79 : vector<8x8xf32>
    %c0_41 = arith.constant 0 : index
    %c2 = arith.constant 2 : index
    %c0_42 = arith.constant 0 : index
    %c0_43 = arith.constant 0 : index
    %81 = vector.load %arg16[%c0_41, %c2, %c0_42, %c0_43] : memref<1x4x8x8xf32, #tpu.memory_space<vmem>>, vector<1x1x8x8xf32>
    %82 = vector.shape_cast %81 : vector<1x1x8x8xf32> to vector<8x8xf32>
    %83 = vector.shape_cast %80 : vector<8x8xf32> to vector<1x1x8x8xf32>
    tpu.vector_store %arg16[%c0_41, %c2, %c0_42, %c0_43], %83 {strides = array<i32>} : memref<1x4x8x8xf32, #tpu.memory_space<vmem>>, vector<1x1x8x8xf32>,
    %cst_44 = arith.constant dense<0.000000e+00> : vector<8x8xf32>
    %84 = tpu.matmul %80, %66, %cst_44 {dimension_numbers = #tpu.dot_dimension_numbers<[1], [0], [0], [1], [0, 0, 1, 1], [], []>} : vector<8x8xf32>, vector<8x8xf32>, vector<8x8xf32> -> vector<8x8xf32>
    %85 = vector.extract_strided_slice %19 {offsets = [0, 24], sizes = [8, 8], strides = [1, 1]} : vector<8x32xf32> to vector<8x8xf32>
    %86 = vector.extract_strided_slice %5 {offsets = [0, 24], sizes = [8, 8], strides = [1, 1]} : vector<8x32xf32> to vector<8x8xf32>
    %87 = vector.extract_strided_slice %8 {offsets = [0, 24], sizes = [8, 8], strides = [1, 1]} : vector<8x32xf32> to vector<8x8xf32>
    %cst_45 = arith.constant dense<0.000000e+00> : vector<8x8xf32>
    %88 = tpu.matmul %85, %86, %cst_45 {dimension_numbers = #tpu.dot_dimension_numbers<[1], [1], [0], [0], [0, 0, 1, 0], [], []>} : vector<8x8xf32>, vector<8x8xf32>, vector<8x8xf32> -> vector<8x8xf32>
    %cst_46 = arith.constant 0.000000e+00 : bf16
    %89 = vector.broadcast %cst_46 : bf16 to vector<8x8xbf16>
    %90 = arith.cmpf oeq, %21, %89 : vector<8x8xbf16>
    %cst_47 = arith.constant -1.000000e+09 : f32
    %91 = vector.broadcast %cst_47 : f32 to vector<8x8xf32>
    %92 = arith.select %90, %91, %88 : vector<8x8xi1>, vector<8x8xf32>
    %cst_48 = arith.constant dense<0xFF800000> : vector<8xf32>
    %93 = vector.multi_reduction <maximumf>, %92, %cst_48 [1] : vector<8x8xf32> to vector<8xf32>
    %94 = vector.shape_cast %93 : vector<8xf32> to vector<8x1xf32>
    %95 = vector.broadcast %94 : vector<8x1xf32> to vector<8x8xf32>
    %96 = arith.subf %92, %95 : vector<8x8xf32>
    %97 = math.exp %96 : vector<8x8xf32>
    %cst_49 = arith.constant dense<0.000000e+00> : vector<8xf32>
    %98 = vector.multi_reduction <add>, %97, %cst_49 [1] : vector<8x8xf32> to vector<8xf32>
    %99 = vector.shape_cast %98 : vector<8xf32> to vector<8x1xf32>
    %100 = vector.broadcast %99 : vector<8x1xf32> to vector<8x8xf32>
    %101 = arith.divf %97, %100 : vector<8x8xf32>
    %c0_50 = arith.constant 0 : index
    %c3 = arith.constant 3 : index
    %c0_51 = arith.constant 0 : index
    %c0_52 = arith.constant 0 : index
    %102 = vector.load %arg16[%c0_50, %c3, %c0_51, %c0_52] : memref<1x4x8x8xf32, #tpu.memory_space<vmem>>, vector<1x1x8x8xf32>
    %103 = vector.shape_cast %102 : vector<1x1x8x8xf32> to vector<8x8xf32>
    %104 = vector.shape_cast %101 : vector<8x8xf32> to vector<1x1x8x8xf32>
    tpu.vector_store %arg16[%c0_50, %c3, %c0_51, %c0_52], %104 {strides = array<i32>} : memref<1x4x8x8xf32, #tpu.memory_space<vmem>>, vector<1x1x8x8xf32>,
    %cst_53 = arith.constant dense<0.000000e+00> : vector<8x8xf32>
    %105 = tpu.matmul %101, %87, %cst_53 {dimension_numbers = #tpu.dot_dimension_numbers<[1], [0], [0], [1], [0, 0, 1, 1], [], []>} : vector<8x8xf32>, vector<8x8xf32>, vector<8x8xf32> -> vector<8x8xf32>
    %106 = tpu.concatenate %42, %63, %84, %105 in 1 : vector<8x8xf32>, vector<8x8xf32>, vector<8x8xf32>, vector<8x8xf32> -> vector<8x32xf32>
    %c0_54 = arith.constant 0 : index
    %c0_55 = arith.constant 0 : index
    %c0_56 = arith.constant 0 : index
    %107 = vector.load %arg13[%c0_54, %c0_55, %c0_56] : memref<1x32x32xf32, #tpu.memory_space<vmem>>, vector<1x32x32xf32>
    %108 = vector.shape_cast %107 : vector<1x32x32xf32> to vector<32x32xf32>
    %cst_57 = arith.constant dense<0.000000e+00> : vector<8x32xf32>
    %109 = tpu.matmul %106, %108, %cst_57 {dimension_numbers = #tpu.dot_dimension_numbers<[1], [0], [0], [1], [0, 0, 1, 1], [], []>} : vector<8x32xf32>, vector<32x32xf32>, vector<8x32xf32> -> vector<8x32xf32>
    %c0_i32_58 = arith.constant 0 : i32
    %110 = arith.cmpi eq, %arg2, %c0_i32_58 : i32
    %111 = arith.extui %110 : i1 to i32
    %c0_i32_59 = arith.constant 0 : i32
    %112 = arith.cmpi ne, %111, %c0_i32_59 : i32
    scf.if %112 {
      %c0_62 = arith.constant 0 : index
      %c0_63 = arith.constant 0 : index
      %116 = vector.load %arg14[%c0_62, %c0_63] : memref<1x32xf32, #tpu.memory_space<vmem>>, vector<1x32xf32>
      %117 = vector.broadcast %116 : vector<1x32xf32> to vector<8x32xf32>
      %118 = arith.addf %109, %117 : vector<8x32xf32>
      %c0_64 = arith.constant 0 : index
      %c0_65 = arith.constant 0 : index
      %c0_66 = arith.constant 0 : index
      %119 = vector.load %arg15[%c0_64, %c0_65, %c0_66] : memref<1x8x32xf32, #tpu.memory_space<vmem>>, vector<1x8x32xf32>
      %120 = vector.shape_cast %119 : vector<1x8x32xf32> to vector<8x32xf32>
      %121 = vector.shape_cast %118 : vector<8x32xf32> to vector<1x8x32xf32>
      tpu.vector_store %arg15[%c0_64, %c0_65, %c0_66], %121 {strides = array<i32>} : memref<1x8x32xf32, #tpu.memory_space<vmem>>, vector<1x8x32xf32>,
    } else {
    }
    %c0_i32_60 = arith.constant 0 : i32
    %113 = arith.cmpi sgt, %arg2, %c0_i32_60 : i32
    %114 = arith.extui %113 : i1 to i32
    %c0_i32_61 = arith.constant 0 : i32
    %115 = arith.cmpi ne, %114, %c0_i32_61 : i32
    scf.if %115 {
      %c0_62 = arith.constant 0 : index
      %c0_63 = arith.constant 0 : index
      %c0_64 = arith.constant 0 : index
      %116 = vector.load %arg15[%c0_62, %c0_63, %c0_64] : memref<1x8x32xf32, #tpu.memory_space<vmem>>, vector<1x8x32xf32>
      %117 = vector.shape_cast %116 : vector<1x8x32xf32> to vector<8x32xf32>
      %118 = arith.addf %117, %109 : vector<8x32xf32>
      %c0_65 = arith.constant 0 : index
      %c0_66 = arith.constant 0 : index
      %c0_67 = arith.constant 0 : index
      %119 = vector.load %arg15[%c0_65, %c0_66, %c0_67] : memref<1x8x32xf32, #tpu.memory_space<vmem>>, vector<1x8x32xf32>
      %120 = vector.shape_cast %119 : vector<1x8x32xf32> to vector<8x32xf32>
      %121 = vector.shape_cast %118 : vector<8x32xf32> to vector<1x8x32xf32>
      tpu.vector_store %arg15[%c0_65, %c0_66, %c0_67], %121 {strides = array<i32>} : memref<1x8x32xf32, #tpu.memory_space<vmem>>, vector<1x8x32xf32>,
    } else {
    }
    return
  }
  func.func @transform_0(%arg0: i32, %arg1: i32, %arg2: i32) -> (i32, i32, i32) {
    %c0_i32 = arith.constant 0 : i32
    %c0_i32_0 = arith.constant 0 : i32
    return %arg0, %arg1, %c0_i32 : i32, i32, i32
  }
  func.func @transform_1(%arg0: i32, %arg1: i32, %arg2: i32) -> (i32, i32, i32) {
    %c0_i32 = arith.constant 0 : i32
    %c0_i32_0 = arith.constant 0 : i32
    %c0_i32_1 = arith.constant 0 : i32
    return %arg0, %c0_i32, %c0_i32_0 : i32, i32, i32
  }
  func.func @transform_2(%arg0: i32, %arg1: i32, %arg2: i32) -> (i32, i32, i32) {
    %c0_i32 = arith.constant 0 : i32
    %c0_i32_0 = arith.constant 0 : i32
    %c0_i32_1 = arith.constant 0 : i32
    return %arg0, %c0_i32, %c0_i32_0 : i32, i32, i32
  }
  func.func @transform_3(%arg0: i32, %arg1: i32, %arg2: i32) -> (i32, i32, i32) {
    %c0_i32 = arith.constant 0 : i32
    %c0_i32_0 = arith.constant 0 : i32
    return %arg0, %arg1, %c0_i32 : i32, i32, i32
  }
  func.func @transform_4(%arg0: i32, %arg1: i32, %arg2: i32) -> (i32, i32, i32) {
    %c0_i32 = arith.constant 0 : i32
    %c0_i32_0 = arith.constant 0 : i32
    %c0_i32_1 = arith.constant 0 : i32
    return %arg2, %c0_i32, %c0_i32_0 : i32, i32, i32
  }
  func.func @transform_5(%arg0: i32, %arg1: i32, %arg2: i32) -> (i32, i32, i32) {
    %c0_i32 = arith.constant 0 : i32
    %c0_i32_0 = arith.constant 0 : i32
    %c0_i32_1 = arith.constant 0 : i32
    return %arg2, %c0_i32, %c0_i32_0 : i32, i32, i32
  }
  func.func @transform_6(%arg0: i32, %arg1: i32, %arg2: i32) -> (i32, i32, i32) {
    %c0_i32 = arith.constant 0 : i32
    %c0_i32_0 = arith.constant 0 : i32
    %c0_i32_1 = arith.constant 0 : i32
    return %arg2, %c0_i32, %c0_i32_0 : i32, i32, i32
  }
  func.func @transform_7(%arg0: i32, %arg1: i32, %arg2: i32) -> (i32, i32, i32) {
    %c0_i32 = arith.constant 0 : i32
    %c0_i32_0 = arith.constant 0 : i32
    %c0_i32_1 = arith.constant 0 : i32
    return %arg2, %c0_i32, %c0_i32_0 : i32, i32, i32
  }
  func.func @transform_8(%arg0: i32, %arg1: i32, %arg2: i32) -> (i32, i32, i32) {
    %c0_i32 = arith.constant 0 : i32
    %c0_i32_0 = arith.constant 0 : i32
    %c0_i32_1 = arith.constant 0 : i32
    return %arg2, %c0_i32, %c0_i32_0 : i32, i32, i32
  }
  func.func @transform_9(%arg0: i32, %arg1: i32, %arg2: i32) -> (i32, i32, i32) {
    %c0_i32 = arith.constant 0 : i32
    %c0_i32_0 = arith.constant 0 : i32
    %c0_i32_1 = arith.constant 0 : i32
    return %arg2, %c0_i32, %c0_i32_0 : i32, i32, i32
  }
  func.func @transform_10(%arg0: i32, %arg1: i32, %arg2: i32) -> (i32, i32, i32) {
    %c0_i32 = arith.constant 0 : i32
    %c0_i32_0 = arith.constant 0 : i32
    %c0_i32_1 = arith.constant 0 : i32
    return %arg2, %c0_i32, %c0_i32_0 : i32, i32, i32
  }
  func.func @transform_11(%arg0: i32, %arg1: i32, %arg2: i32) -> (i32, i32) {
    %c0_i32 = arith.constant 0 : i32
    %c0_i32_0 = arith.constant 0 : i32
    %c0_i32_1 = arith.constant 0 : i32
    return %c0_i32, %c0_i32_0 : i32, i32
  }
  func.func @transform_12(%arg0: i32, %arg1: i32, %arg2: i32) -> (i32, i32, i32) {
    %c0_i32 = arith.constant 0 : i32
    %c0_i32_0 = arith.constant 0 : i32
    return %arg0, %arg1, %c0_i32 : i32, i32, i32
  }
  func.func @transform_13(%arg0: i32, %arg1: i32, %arg2: i32) -> (i32, i32, i32, i32) {
    %c0_i32 = arith.constant 0 : i32
    %c0_i32_0 = arith.constant 0 : i32
    return %arg0, %arg2, %arg1, %c0_i32 : i32, i32, i32, i32
  }
}

</mosaic_0001>

<bundles_post_ra>
// kernel: tpu_custom_call.1
= control target key start
LH: loop header
LB: loop body
LE: loop exit
PB: predicated region body
PF: predicated region fallthrough
CT: control target
= control target key end

     0   :  { %s3459_s0 = inlined_call_operand.hbm [shape: f32[2,8,32], index: 0, kind: input, shape index: {}]   ;;  %s3460_s1 = inlined_call_operand.hbm [shape: f32[2,8,32], index: 1, kind: input, shape index: {}]   ;;  %s3461_s2 = inlined_call_operand.hbm [shape: f32[2,8,32], index: 2, kind: input, shape index: {}]   ;;  %s3462_s3 = inlined_call_operand.hbm [shape: bf16[2,8,8], index: 3, kind: input, shape index: {}]   ;;  %s3463_s4 = inlined_call_operand.hbm [shape: f32[1,32,32], index: 4, kind: input, shape index: {}]   ;;  %s3464_s5 = inlined_call_operand.vmem [shape: f32[1,1,32], index: 5, kind: input, shape index: {}]   ;;  %s3465_s6 = inlined_call_operand.hbm [shape: f32[1,32,32], index: 6, kind: input, shape index: {}]   ;;  %s3466_s7 = inlined_call_operand.vmem [shape: f32[1,1,32], index: 7, kind: input, shape index: {}]   ;;  %s3467_s8 = inlined_call_operand.hbm [shape: f32[1,32,32], index: 8, kind: input, shape index: {}]   ;;  %s3468_s9 = inlined_call_operand.vmem [shape: f32[1,1,32], index: 9, kind: input, shape index: {}]   ;;  %s3469_s10 = inlined_call_operand.vmem [shape: f32[1,32,32], index: 10, kind: input, shape index: {}]   ;;  %s3470_s11 = inlined_call_operand.vmem [shape: f32[1,32], index: 11, kind: input, shape index: {}]   ;;  %s3471_s12 = inlined_call_operand.hbm [shape: f32[2,8,32], index: 12, kind: output, shape index: {0}]   ;;  %s3472_s13 = inlined_call_operand.hbm [shape: f32[2,4,8,8], index: 13, kind: output, shape index: {1}]  }
   0x1   :  { %3495 = sst [smem:[#allocation33_spill]] %s3460_s1 }
   0x2   :  { %3496 = sst [smem:[#allocation34_spill]] %s3463_s4 }
   0x3   :  { %3497 = sst [smem:[#allocation35_spill]] %s3464_s5 }
   0x4   :  { %3498 = sst [smem:[#allocation36_spill]] %s3465_s6 }
   0x5   :  { %3499 = sst [smem:[#allocation37_spill]] %s3468_s9 }
   0x6   :  { %3500 = sst [smem:[#allocation38_spill]] %s3469_s10 }
   0x7   :  { %3501 = sst [smem:[#allocation39_spill]] %s3470_s11 }
   0x8   :  { %3502 = sst [smem:[#allocation40_spill]] %s3471_s12 }
   0x9   :  { %3503 = sst [smem:[#allocation41_spill]] %s3472_s13 }
   0xa   :  { %19 = vsyncpa [#allocation5], 0 }
   0xb   :  { %21 = vsyncpa [#allocation5 + $0x1], 0 }
   0xc   :  { %22 = vsyncpa [#allocation8], 0 }
   0xd   :  { %24 = vsyncpa [#allocation8 + $0x1], 0 }
   0xe   :  { %25 = vsyncpa [#allocation11], 0 }
   0xf   :  { %27 = vsyncpa [#allocation11 + $0x1], 0 }
  0x10   :  { %28 = vsyncpa [#allocation14], 0 }
  0x11   :  { %29 = vsyncpa [#allocation6], 0 }
  0x12   :  { %31 = vsyncpa [#allocation6 + $0x1], 0 }
  0x13   :  { %32 = vsyncpa [#allocation18], 0 }
  0x14   :  { %34 = vsyncpa [#allocation18 + $0x1], 0  ;;  %s2890_s25 = smov 0   ;;  %s2892_s26 = smov 0  }
  0x15   :  { %s2894_s27 = smov 0   ;;  %s2896_s28 = smov 0  }
  0x16   :  { %s2898_s29 = smov 0   ;;  %s2900_s30 = smov 0  }
  0x17 LB: > { %3504 = sst [smem:[#allocation26_spill]] %s2776_s25  ;;  %s2921_s14 = sadd.s32 4294967295, %s2796_s30   ;;  %s2796_s30 = sphi %s2900_s30, %s40_s30   ;;  %s2792_s29 = sphi %s2898_s29, %s3559_s29   ;;  %s2788_s28 = sphi %s2896_s28, %s3558_s28   ;;  %s2784_s27 = sphi %s2894_s27, %s3554_s27   ;;  %s2780_s26 = sphi %s2892_s26, %s3557_s26   ;;  %s2776_s25 = sphi %s2890_s25, %s3556_s25  }
  0x18   : > { %3505 = sst [smem:[#allocation27_spill]] %s2784_s27  ;;  %s2117_s15 = sadd.s32 4294967294, %s2796_s30  }
  0x19   : > { %3506 = sst [smem:[#allocation28_spill]] %s2788_s28  ;;  %p81_p0 = scmp.ne.s32.totalorder %s2780_s26, %s2776_s25 }
  0x1a   : > { %p3476_p1 = scmp.eq.s32.totalorder %s2921_s14, 0  ;;  %p396_p3 = scmp.eq.s32.totalorder %s2117_s15, 1 }
  0x1b   : > { %p2118_p5 = scmp.ge.s32.totalorder %s2796_s30, 1  ;;  %p433_p7 = scmp.lt.s32.totalorder %s2796_s30, 3 }
  0x1c   : > { %p2930_p4 = por %p3476_p1, %p81_p0  ;;  %p2935_p6 = por %p396_p3, %p81_p0 }
  0x1d   : > { %p2940_p8 = pnand %p2118_p5, %p433_p7  ;;  %s2798_s19 = smov [#allocation12]  }
  0x1e   : > { %s3507_s16 = scalar_select %p2930_p4, 1, 0 }
  0x1f   : > { %s3508_s17 = scalar_select %p2935_p6, 1, 0 }
  0x20   : > { %s3510_s18 = scalar_select %p2940_p8, 1, 0 }
  0x21   : > { %3509 = sst [smem:[#allocation29_spill]] %s3508_s17  ;;  %s448_s20 = sshll.u32 %s2798_s19, 4  ;;  %s2944_s20 = int_to_ptr.vmem [resolvable:$true] %s448_s20 }
  0x22   : > { %p2344_p9 = pneg %p2940_p8  ;;  %s2799_s22 = smov [#allocation13]  }
  0x23   : > { %s470_s23 = sshll.u32 %s2799_s22, 4  ;;  %s3512_s4 = sld [smem:[#allocation34_spill]]  ;;  %s2955_s23 = int_to_ptr.vmem [resolvable:$true] %s470_s23 }
  0x24   : > { %p2951_p11 = pnand %p2344_p9, %p3476_p1 }
  0x26   : > { %s3511_s21 = scalar_select %p2951_p11, 1, 0 }
  0x27   : > { %p2965_p13 = pneg %p2951_p11 }
  0x29   : > { %s2462_s17 = scalar_lea.hbm %s3512_s4, 512 }
  0x2a   : > { %p2463_p12 = scmp.ne.s32.totalorder %s3512_s4, %s2462_s17  ;;  %p2469_p5 = scmp.lt.u32.totalorder %s2462_s17, %s3512_s4 }
  0x2b   : > { %s3513_s12 = scalar_select %p2965_p13, 1, 0 }
  0x2c   : > { %p2465_p0 = pnand %p2965_p13, %p2463_p12 }
  0x2e   : > { %p2466_p3 = pneg %p2465_p0 }
  0x30   : > { %p2471_p7 = pnand %p2469_p5, %p2466_p3 }
  0x32   : > { %2474 = shalt.err (!%p2471_p7)
}
  0x33   : > { %s2475_s25 = scalar_lea.vmem %s2944_s20, 512  ;;  %p2483_p2 = scmp.lt.s32.totalorder %s2944_s20, %s2944_s20 }
  0x34   : > { %p2476_p9 = scmp.ne.s32.totalorder %s2944_s20, %s2475_s25  ;;  %p2484_p6 = scmp.lt.s32.totalorder %s2475_s25, %s2475_s25 }
  0x36   : > { %p2478_p10 = pnand %p2476_p9, %p2965_p13  ;;  %p2485_p12 = por %p2484_p6, %p2483_p2 }
  0x38   : > { %p2479_p1 = pneg %p2478_p10 }
  0x3a   : > { %p2486_p0 = pnand %p2485_p12, %p2479_p1 }
  0x3c   : > { %2489 = shalt.err (!%p2486_p0)
}
  0x3d   : > { %s3480_s24 = smov 128   ;;  %s3481_s11 = smov 8  }
  0x3e   : > { %2347 = dma.hbm_to_vmem [thread:$0]  (!%p2951_p11), %s3512_s4, 512, %s2944_s20, [#allocation11], %s3480_s24, %s3480_s24, %s3481_s11  }
  0x3f   : > { %s3514_s6 = sld [smem:[#allocation36_spill]] }
  0x45   : > { %s2490_s25 = scalar_lea.hbm %s3514_s6, 512 }
  0x46   : > { %p2491_p1 = scmp.ne.s32.totalorder %s3514_s6, %s2490_s25  ;;  %p2497_p10 = scmp.lt.u32.totalorder %s2490_s25, %s3514_s6 }
  0x48   : > { %p2493_p2 = pnand %p2491_p1, %p2965_p13 }
  0x4a   : > { %p2494_p6 = pneg %p2493_p2 }
  0x4c   : > { %p2499_p3 = pnand %p2497_p10, %p2494_p6 }
  0x4e   : > { %2502 = shalt.err (!%p2499_p3)
}
  0x4f   : > { %s2503_s20 = scalar_lea.vmem %s2955_s23, 512  ;;  %p2511_p12 = scmp.lt.s32.totalorder %s2955_s23, %s2955_s23 }
  0x50   : > { %p2504_p5 = scmp.ne.s32.totalorder %s2955_s23, %s2503_s20  ;;  %p2512_p0 = scmp.lt.s32.totalorder %s2503_s20, %s2503_s20 }
  0x52   : > { %p2506_p7 = pnand %p2504_p5, %p2965_p13  ;;  %p2513_p1 = por %p2512_p0, %p2511_p12 }
  0x54   : > { %p2507_p9 = pneg %p2506_p7 }
  0x56   : > { %p2514_p2 = pnand %p2513_p1, %p2507_p9 }
  0x58   : > { %2517 = shalt.err (!%p2514_p2)
}
  0x59   : > { %2350 = dma.hbm_to_vmem [thread:$0]  (!%p2951_p11), %s3514_s6, 512, %s2955_s23, [#allocation14], %s3480_s24, %s3480_s24, %s3481_s11  }
  0x5a   : > { %s59_s13 = sadd.s32 1, %s2792_s29  ;;  %s68_s28 = sadd.s32 1, %s2784_s27 }
  0x5b   : > { %p61_p6 = scmp.ge.s32.totalorder %s59_s13, 2  ;;  %p75_p10 = scmp.ne.s32.totalorder %s2784_s27, %s2780_s26 }
  0x5c   : > { %p76_p3 = scmp.eq.s32.totalorder %s2796_s30, 0  ;;  %p2377_p5 = scmp.lt.s32.totalorder %s2796_s30, 2 }
  0x5d   : > { %s3561_s13 = smov (%p61_p6, %s59_s13), 0  ;;  %p3516_p9 = scmp.eq.s32.totalorder %s2921_s14, 1 }
  0x5e   : > { %3515 = sst [smem:[#allocation30_spill]] %s3561_s13  ;;  %p77_p7 = por %p76_p3, %p75_p10 }
  0x5f   : > { %p3025_p12 = por %p3516_p9, %p75_p10  ;;  %s63_s15 = ssub.s32 %s2792_s29, %s3561_s13 }
  0x60   : > { %s3032_s23 = sand.u32 1, %s2784_s27   ;;  %p66_p0 = scmp.eq.s32.totalorder %s63_s15, 0 }
  0x61   : > { %s3517_s17 = scalar_select %p3025_p12, 1, 0 }
  0x62   : > { %s3035_s19 = sshll.u32 %s3032_s23, 3  ;;  %s3038_s22 = sshll.u32 %s2792_s29, 7 }
  0x63   : > { %3518 = sst [smem:[#allocation31_spill]] %s3517_s17  ;;  %p3040_p1 = pnand %p2377_p5, %p77_p7 }
  0x64   : > { %s3045_s20 = scalar_select %p66_p0, %s2784_s27, %s68_s28  }
  0x65   : > { %s3519_s25 = scalar_select %p3040_p1, 1, 0 }
  0x66   : > { %3520 = sst [smem:[#allocation32_spill]] %s3045_s20  ;;  %s3486_s9 = sand.u32 1, %s2796_s30  }
  0x67   : > { %s3521_s1 = sld [smem:[#allocation33_spill]]  ;;  %s546_s15 = scalar_lea.vmem [#allocation7], %s3035_s19 }
  0x68   : > { %s553_s4 = sshll.u32 %s546_s15, 4  ;;  %s3059_s6 = scalar_lea.sflag [#allocation8], %s3486_s9  ;;  %s3055_s4 = int_to_ptr.vmem [resolvable:$true] %s553_s4 }
  0x69   : > { %p3065_p6 = pneg %p3040_p1 }
  0x6d   : > { %s3052_s11 = scalar_lea.hbm %s3521_s1, %s3038_s22  ;;  %s2523_s15 = scalar_lea.hbm %s3521_s1, 256 }
  0x6e   : > { %s2518_s13 = scalar_lea.hbm %s3052_s11, 128  ;;  %p2524_p5 = scmp.lt.u32.totalorder %s3052_s11, %s3521_s1 }
  0x6f   : > { %p2519_p2 = scmp.ne.s32.totalorder %s3052_s11, %s2518_s13  ;;  %p2525_p7 = scmp.lt.u32.totalorder %s2523_s15, %s2518_s13 }
  0x70   : > { %p2527_p0 = scmp.lt.u32.totalorder %s2518_s13, %s3052_s11 }
  0x71   : > { %p2521_p10 = pnand %p3065_p6, %p2519_p2  ;;  %p2526_p9 = por %p2525_p7, %p2524_p5 }
  0x73   : > { %p2522_p3 = pneg %p2521_p10  ;;  %p2528_p12 = por %p2527_p0, %p2526_p9 }
  0x75   : > { %p2529_p4 = pnand %p2528_p12, %p2522_p3 }
  0x77   : > { %2532 = shalt.err (!%p2529_p4)
}
  0x78   : > { %s2533_s9 = scalar_lea.vmem %s3055_s4, 128  ;;  %s2802_s24 = smov [#allocation7]  }
  0x79   : > { %p2534_p2 = scmp.ne.s32.totalorder %s3055_s4, %s2533_s9  ;;  %s2538_s10 = sshll.u32 %s2802_s24, 4  ;;  %s2539_s10 = int_to_ptr.vmem [resolvable:$false] %s2538_s10 }
  0x7a   : > { %s2540_s27 = scalar_lea.vmem %s2539_s10, 256  ;;  %p2541_p11 = scmp.lt.s32.totalorder %s3055_s4, %s2539_s10 }
  0x7b   : > { %p2536_p10 = pnand %p2534_p2, %p3065_p6  ;;  %p2542_p13 = scmp.lt.s32.totalorder %s2540_s27, %s2533_s9 }
  0x7d   : > { %p2537_p8 = pneg %p2536_p10  ;;  %p2543_p5 = por %p2542_p13, %p2541_p11 }
  0x7f   : > { %p2544_p7 = pnand %p2543_p5, %p2537_p8 }
  0x81   : > { %2547 = shalt.err (!%p2544_p7)
}
  0x82   : > { %2360 = dma.hbm_to_vmem [thread:$0]  (!%p3040_p1), %s3052_s11, 128, %s3055_s4, %s3059_s6  }
  0x83   : > { %s2803_s13 = smov [#allocation15]   ;;  %s3093_s1 = scalar_lea.hbm %s3459_s0, %s3038_s22 }
  0x84   : > { %s492_s20 = sshll.u32 %s2803_s13, 4  ;;  %s2548_s27 = scalar_lea.hbm %s3467_s8, 512  ;;  %s493_s20 = int_to_ptr.vmem [resolvable:$true] %s492_s20 }
  0x85   : > { %p2549_p4 = scmp.ne.s32.totalorder %s3467_s8, %s2548_s27  ;;  %p3523_p8 = scmp.ne.s32.totalorder %s3513_s12, 0 }
  0x86   : > { %p2555_p12 = scmp.lt.u32.totalorder %s2548_s27, %s3467_s8 }
  0x87   : > { %p2551_p11 = pnand %p2549_p4, %p3523_p8 }
  0x89   : > { %p2552_p13 = pneg %p2551_p11 }
  0x8b   : > { %p2557_p3 = pnand %p2555_p12, %p2552_p13 }
  0x8d   : > { %2560 = shalt.err (!%p2557_p3)
}
  0x8e   : > { %s2561_s13 = scalar_lea.vmem %s493_s20, 512  ;;  %p2569_p10 = scmp.lt.s32.totalorder %s493_s20, %s493_s20 }
  0x8f   : > { %p2562_p9 = scmp.ne.s32.totalorder %s493_s20, %s2561_s13  ;;  %p2570_p5 = scmp.lt.s32.totalorder %s2561_s13, %s2561_s13 }
  0x91   : > { %p2564_p0 = pnand %p2562_p9, %p3523_p8  ;;  %p2571_p7 = por %p2570_p5, %p2569_p10 }
  0x93   : > { %p2565_p2 = pneg %p2564_p0 }
  0x95   : > { %p2572_p1 = pnand %p2571_p7, %p2565_p2 }
  0x97   : > { %2575 = shalt.err (!%p2572_p1)
}
  0x98   : > { %p3524_p4 = scmp.ne.s32.totalorder %s3511_s21, 0  ;;  %s3525_s5 = smov 8  }
  0x99   : > { %s3526_s17 = smov 128   ;;  %s527_s12 = scalar_lea.vmem [#allocation4], %s3035_s19 }
  0x9a   : > { %2353 = dma.hbm_to_vmem [thread:$0]  (!%p3524_p4), %s3467_s8, 512, %s493_s20, [#allocation14], %s3526_s17, %s3526_s17, %s3525_s5  }
  0x9b   : > { %s535_s9 = sshll.u32 %s527_s12, 4  ;;  %s3123_s27 = scalar_lea.hbm %s3461_s2, %s3038_s22  ;;  %s3117_s9 = int_to_ptr.vmem [resolvable:$true] %s535_s9 }
  0x9c   : > { %s524_s4 = scalar_lea.sflag [#allocation5], %s3032_s23  ;;  %s2576_s11 = scalar_lea.hbm %s3093_s1, 128 }
  0x9d   : > { %p2577_p1 = scmp.ne.s32.totalorder %s3093_s1, %s2576_s11  ;;  %s2581_s24 = scalar_lea.hbm %s3459_s0, 256 }
  0x9e   : > { %p2582_p13 = scmp.lt.u32.totalorder %s3093_s1, %s3459_s0  ;;  %p2583_p12 = scmp.lt.u32.totalorder %s2581_s24, %s2576_s11 }
  0x9f   : > { %p2579_p8 = pnand %p2577_p1, %p3065_p6  ;;  %p2585_p9 = scmp.lt.u32.totalorder %s2576_s11, %s3093_s1 }
  0xa0   : > { %p2584_p3 = por %p2583_p12, %p2582_p13 }
  0xa1   : > { %p2580_p11 = pneg %p2579_p8 }
  0xa2   : > { %p2586_p0 = por %p2585_p9, %p2584_p3 }
  0xa4   : > { %p2587_p2 = pnand %p2586_p0, %p2580_p11 }
  0xa6   : > { %2590 = shalt.err (!%p2587_p2)
}
  0xa7   : > { %s2591_s22 = scalar_lea.vmem %s3117_s9, 128  ;;  %s2804_s17 = smov [#allocation4]  }
  0xa8   : > { %p2592_p10 = scmp.ne.s32.totalorder %s3117_s9, %s2591_s22  ;;  %s2596_s12 = sshll.u32 %s2804_s17, 4  ;;  %s2597_s12 = int_to_ptr.vmem [resolvable:$false] %s2596_s12 }
  0xa9   : > { %s2598_s21 = scalar_lea.vmem %s2597_s12, 256  ;;  %p2599_p4 = scmp.lt.s32.totalorder %s3117_s9, %s2597_s12 }
  0xaa   : > { %p2594_p5 = pnand %p2592_p10, %p3065_p6  ;;  %p2600_p1 = scmp.lt.s32.totalorder %s2598_s21, %s2591_s22 }
  0xac   : > { %p2595_p7 = pneg %p2594_p5  ;;  %p2601_p8 = por %p2600_p1, %p2599_p4 }
  0xae   : > { %p2602_p13 = pnand %p2601_p8, %p2595_p7 }
  0xb0   : > { %2605 = shalt.err (!%p2602_p13)
}
  0xb1   : > { %p3527_p11 = scmp.ne.s32.totalorder %s3519_s25, 0  ;;  %s564_s10 = scalar_lea.vmem [#allocation9], %s3035_s19 }
  0xb2   : > { %s571_s11 = sshll.u32 %s564_s10, 4  ;;  %s2133_s13 = sshll.u32 %s3032_s23, 2  ;;  %s572_s11 = int_to_ptr.vmem [resolvable:$true] %s571_s11 }
  0xb3   : > { %2357 = dma.hbm_to_vmem [thread:$0]  (!%p3527_p11), %s3093_s1, 128, %s3117_s9, %s524_s4  }
  0xb4   : > { %s2606_s15 = scalar_lea.hbm %s3123_s27, 128  ;;  %s2611_s5 = scalar_lea.hbm %s3461_s2, 256 }
  0xb5   : > { %p2607_p12 = scmp.ne.s32.totalorder %s3123_s27, %s2606_s15  ;;  %p2612_p0 = scmp.lt.u32.totalorder %s3123_s27, %s3461_s2 }
  0xb6   : > { %p2613_p2 = scmp.lt.u32.totalorder %s2611_s5, %s2606_s15  ;;  %p2615_p5 = scmp.lt.u32.totalorder %s2606_s15, %s3123_s27 }
  0xb7   : > { %p2609_p3 = pnand %p2607_p12, %p3065_p6 }
  0xb8   : > { %p2614_p10 = por %p2613_p2, %p2612_p0 }
  0xb9   : > { %p2610_p9 = pneg %p2609_p3 }
  0xba   : > { %p2616_p7 = por %p2615_p5, %p2614_p10 }
  0xbc   : > { %p2617_p4 = pnand %p2616_p7, %p2610_p9 }
  0xbe   : > { %2620 = shalt.err (!%p2617_p4)
}
  0xbf   : > { %s2621_s1 = scalar_lea.vmem %s572_s11, 128  ;;  %s2805_s19 = smov [#allocation9]  }
  0xc0   : > { %p2622_p1 = scmp.ne.s32.totalorder %s572_s11, %s2621_s1  ;;  %s2626_s9 = sshll.u32 %s2805_s19, 4  ;;  %s2627_s9 = int_to_ptr.vmem [resolvable:$false] %s2626_s9 }
  0xc1   : > { %s2628_s4 = scalar_lea.vmem %s2627_s9, 256  ;;  %p2629_p12 = scmp.lt.s32.totalorder %s572_s11, %s2627_s9 }
  0xc2   : > { %p2624_p8 = pnand %p2622_p1, %p3065_p6  ;;  %p2630_p3 = scmp.lt.s32.totalorder %s2628_s4, %s2621_s1 }
  0xc4   : > { %p2625_p13 = pneg %p2624_p8  ;;  %p2631_p11 = por %p2630_p3, %p2629_p12 }
  0xc6   : > { %p2632_p0 = pnand %p2631_p11, %p2625_p13 }
  0xc8   : > { %2635 = shalt.err (!%p2632_p0)
}
  0xc9   : > { %p3528_p2 = scmp.ne.s32.totalorder %s3519_s25, 0  ;;  %s2134_s12 = sshll.u32 %s2792_s29, 6 }
  0xca   : > { %s582_s21 = scalar_lea.vmem [#allocation10], %s2133_s13  ;;  %s3173_s20 = scalar_lea.hbm %s3462_s3, %s2134_s12 }
  0xcb   : > { %2363 = dma.hbm_to_vmem [thread:$0]  (!%p3528_p2), %s3123_s27, 128, %s572_s11, %s3059_s6  }
  0xcc   : > { %s590_s10 = sshll.u32 %s582_s21, 4  ;;  %s3529_s5 = sand.u32 1, %s2796_s30   ;;  %s591_s10 = int_to_ptr.vmem [resolvable:$true] %s590_s10 }
  0xcd   : > { %s579_s22 = scalar_lea.sflag [#allocation11], %s3529_s5  ;;  %s2636_s17 = scalar_lea.hbm %s3173_s20, 64 }
  0xce   : > { %p2637_p11 = scmp.ne.s32.totalorder %s3173_s20, %s2636_s17  ;;  %s2641_s27 = scalar_lea.hbm %s3462_s3, 128 }
  0xcf   : > { %p2642_p5 = scmp.lt.u32.totalorder %s3173_s20, %s3462_s3  ;;  %p2643_p7 = scmp.lt.u32.totalorder %s2641_s27, %s2636_s17 }
  0xd0   : > { %p2639_p9 = pnand %p2637_p11, %p3065_p6  ;;  %p2645_p1 = scmp.lt.u32.totalorder %s2636_s17, %s3173_s20 }
  0xd1   : > { %p2644_p4 = por %p2643_p7, %p2642_p5 }
  0xd2   : > { %p2640_p10 = pneg %p2639_p9 }
  0xd3   : > { %p2646_p8 = por %p2645_p1, %p2644_p4 }
  0xd5   : > { %p2647_p13 = pnand %p2646_p8, %p2640_p10 }
  0xd7   : > { %2650 = shalt.err (!%p2647_p13)
}
  0xd8   : > { %s2651_s1 = scalar_lea.vmem %s591_s10, 64  ;;  %s2806_s19 = smov [#allocation10]  }
  0xd9   : > { %p2652_p12 = scmp.ne.s32.totalorder %s591_s10, %s2651_s1  ;;  %s2656_s9 = sshll.u32 %s2806_s19, 4  ;;  %s2657_s9 = int_to_ptr.vmem [resolvable:$false] %s2656_s9 }
  0xda   : > { %s2658_s4 = scalar_lea.vmem %s2657_s9, 128  ;;  %p2659_p11 = scmp.lt.s32.totalorder %s591_s10, %s2657_s9 }
  0xdb   : > { %p2654_p3 = pnand %p2652_p12, %p3065_p6  ;;  %p2660_p9 = scmp.lt.s32.totalorder %s2658_s4, %s2651_s1 }
  0xdd   : > { %p2655_p0 = pneg %p2654_p3  ;;  %p2661_p2 = por %p2660_p9, %p2659_p11 }
  0xdf   : > { %p2662_p5 = pnand %p2661_p2, %p2655_p0 }
  0xe1   : > { %2665 = shalt.err (!%p2662_p5)
}
  0xe2   : > { %p3530_p7 = scmp.ne.s32.totalorder %s3519_s25, 0  ;;  %p3531_p10 = scmp.ne.s32.totalorder %s3510_s18, 0 }
  0xe3   : > { %s3197_s28 = sand.u32 (!%p3531_p10), 1, %s2780_s26   ;;  %p3532_p6 = scmp.ne.s32.totalorder (!%p3531_p10), %s3507_s16, 0 }
  0xe4   : > { %2366 = dma.hbm_to_vmem [thread:$0]  (!%p3530_p7), %s3173_s20, 64, %s591_s10, %s579_s22  }
  0xe5   : > { %599 = sbr.rel (%p3531_p10) target bundleno = 2163 (0x873), region = 68  ;;  %s3200_s12 = sshll.u32 (!%p3531_p10), %s3197_s28, 3 }
  0xe6   : > { %s602_s21 = scalar_lea.sflag (!%p3531_p10), [#allocation5], %s3197_s28  ;;  %s605_s15 = scalar_lea.vmem (!%p3531_p10), [#allocation4], %s3200_s12 }
  0xec   : > { %2747 = dma.done.wait (%p3532_p6), %s602_s21, 128  }
  0xed   : > { %2749 = vsyncadd (%p3532_p6), %s602_s21, 4294967168  ;;  %s610_s18 = sand.u32 1, %s2921_s14   ;;  %s614_s10 = scalar_lea.vmem [#allocation7], %s3200_s12 }
  0xee   : > { %s611_s25 = scalar_lea.sflag [#allocation8], %s610_s18 }
  0xef   : > { %2751 = dma.done.wait (%p3532_p6), %s611_s25, 256  }
  0xf0   : > { %2753 = vsyncadd (%p3532_p6), %s611_s25, 4294967040  ;;  %s2139_s24 = sshll.u32 %s3197_s28, 2  ;;  %s623_s20 = scalar_lea.vmem [#allocation9], %s3200_s12 }
  0xf1   : > { %s629_s5 = scalar_lea.sflag [#allocation11], %s610_s18  ;;  %s3216_s22 = scalar_lea.vmem [#allocation10], %s2139_s24 }
  0xf2   : > { %2755 = dma.done.wait (%p3532_p6), %s629_s5, 64  }
  0xf3   : > { %2757 = vsyncadd (%p3532_p6), %s629_s5, 4294967232  ;;  %p3533_p2 = scmp.eq.s32.totalorder %s2921_s14, 0 }
  0xf5   : > { %2759 = dma.done.wait (%p3533_p2), [#allocation11], 512   ;;  %p3534_p4 = pmov %p3533_p2 }
  0xf6   : > { %p3535_p1 = pmov %p3533_p2 }
  0xf7   : > { %2761 = vsyncadd (%p3534_p4), [#allocation11], 4294966784 }
  0xf8   : > { %2763 = dma.done.wait (%p3535_p1), [#allocation14], 1024   ;;  %p3536_p8 = pmov %p3535_p1 }
  0xf9   : > { %v2807_v0 = vmov 0.0|0.0   ;;  %vm2808_vm0 = vmmov 0   ;;  %v2809_v1 = vmov 0.0   ;;  %v744_v2 = vld [vmem:[#allocation13] sm:$0xff]  ;;  %v745_v3 = vld [vmem:[#allocation13 + $0x8] sm:$0xff]  ;;  %v746_v4 = vld [vmem:[#allocation13 + $0x10] sm:$0xff] }
  0xfa   : > { %2765 = vsyncadd (%p3536_p8), [#allocation14], 4294966272  ;;  %2296 = vmatprep.subr.bf16.mxu0 %v2807_v0  ;;  %2220 = vmatprep.mubr.msk.f32.mxu0 %vm2808_vm0, %v2809_v1  ;;  %v2297_v5 = vpack.c.bf16 %v745_v3, %v744_v2  ;;  %v747_v6 = vld [vmem:[#allocation13 + $0x18] sm:$0xff]  ;;  %v833_v8 = vld [vmem:[#allocation15] sm:$0xff]  ;;  %vm755_vm1 = vcmask 261120   ;;  %s3537_s23 = sld [smem:[#allocation35_spill]] }
  0xfb   : > { %2302 = vmatprep.subr.bf16.mxu1 %v2807_v0  ;;  %2231 = vmatprep.mubr.msk.f32.mxu1 %vm2808_vm0, %v2809_v1  ;;  %v2300_v7 = vpack.c.bf16 %v747_v6, %v746_v4  ;;  %v834_v9 = vld [vmem:[#allocation15 + $0x8] sm:$0xff]  ;;  %v925_v10 = vld [vmem:[#allocation12] sm:$0xff]  ;;  %v927_v15 = vld [vmem:[#allocation12 + $0x10] sm:$0xff]  ;;  %vm1012_vm2 = vcmask 64512   ;;  %s2810_s27 = smov 120   ;;  %s2811_s11 = smov 112  }
  0xfc   : > { %2298 = vmatpush3.bf16.msra.mxu0 %v2297_v5  ;;  %v926_v11 = vld [vmem:[#allocation12 + $0x8] sm:$0xff]  ;;  %v2303_v12 = vpack.c.bf16 %v834_v9, %v833_v8  ;;  %v743_v13 = vld [vmem:[%s614_s10] sm:$0xff]  ;;  %v835_v19 = vld [vmem:[#allocation15 + $0x10] sm:$0xff]  ;;  %s2812_s13 = smov 104   ;;  %s3538_s9 = sld [smem:[#allocation37_spill]]  ;;  %v2813_v39 = vmov 0  }
  0xfd   : > { %2299 = vmatprep.subr.bf16.mxu0 %v2807_v0  ;;  %v2309_v14 = vpack.c.bf16 %v926_v11, %v925_v10  ;;  %v928_v16 = vld [vmem:[#allocation12 + $0x18] sm:$0xff]  ;;  %v924_v18 = vld [vmem:[%s605_s15] sm:$0xff]  ;;  %s2144_s4 = sshll.u32 %s3197_s28, 5  ;;  %s3541_s25 = sld [smem:[#allocation38_spill]]  ;;  %vm1697_vm5 = vcmask 130048   ;;  %vm1699_vm6 = vcmask 195584  }
  0xfe   : > { %2304 = vmatpush3.bf16.msra.mxu1 %v2303_v12  ;;  %v2312_v17 = vpack.c.bf16 %v928_v16, %v927_v15  ;;  %v836_v20 = vld [vmem:[#allocation15 + $0x18] sm:$0xff]  ;;  %v832_v22 = vld [vmem:[%s623_s20] sm:$0xff]  ;;  %s3303_s21 = scalar_lea.vmem [#allocation17], %s2144_s4  ;;  %s2814_s17 = smov 8  }
  0xff   : > { %2305 = vmatprep.subr.bf16.mxu1 %v2807_v0  ;;  %v2306_v21 = vpack.c.bf16 %v836_v20, %v835_v19  ;;  %v2145_v23 = vld [vmem:[%s3466_s7] ss:$0 sm:$0xff]  ;;  %s2815_s6 = smov 16   ;;  %s1834_s1 = sshll.u32 %s3303_s21, 4  ;;  %s3374_s1 = int_to_ptr.vmem [resolvable:$true] %s1834_s1 }
 0x100   : > { %2301 = vmatpush3.bf16.msra.mxu0 %v2300_v7  ;;  %v2149_v27 = vld [vmem:[%s3537_s23] ss:$0 sm:$0xff]  ;;  %s3543_s23 = sld [smem:[#allocation28_spill]]  ;;  %s3545_s4 = sld [smem:[#allocation41_spill]] }
 0x101   : > { %2308 = vmatprep.subr.bf16.mxu0 %v2807_v0  ;;  %v1011_v38 = vld [vmem:[%s3216_s22] sm:$0xf]  ;;  %s1804_s18 = scalar_lea.sflag [#allocation18], %s3197_s28  ;;  %s2817_s24 = smov [#allocation17]  }
 0x102   : > { %2307 = vmatpush3.bf16.msra.mxu1 %v2306_v21  ;;  %v2147_v33 = vld [vmem:[%s3538_s9] ss:$0 sm:$0xff]  ;;  %vm1089_vm3 = vcmp.eq.bf16.partialorder %v1011_v38, 0  ;;  %s2670_s20 = sshll.u32 %s2817_s24, 4  ;;  %s2671_s20 = int_to_ptr.vmem [resolvable:$false] %s2670_s20 }
 0x103   : > { %2221 = vmatmul.mubr.msk.f32.vlgmr.msra.gmra.mrb[0].mxu0 %vm755_vm1, %v743_v13  ;;  %2245 = vmatprep.subr.mxu1 %v2809_v1  ;;  %v1090_v40 = vsel %vm1089_vm3, 65537, %v2813_v39  ;;  %s3542_s10 = smov %s3541_s25  ;;  %p2673_p11 = scmp.lt.s32.totalorder %s3374_s1, %s2671_s20 }
 0x104   : > { %2310 = vmatpush3.bf16.msra.mxu0 %v2309_v14  ;;  %2242 = vmatprep.mubr.msk.f32.mxu0 %vm2808_vm0, %v2809_v1  ;;  %v1091_v41 = vunpack.c.l.b16 %v1090_v40  ;;  %v1701_v40 = vld [vmem:[%s3541_s25] sm:$0xff]  ;;  %s2666_s25 = scalar_lea.vmem %s3374_s1, 512 }
 0x105   : > { %2311 = vmatprep.subr.bf16.mxu0 %v2807_v0  ;;  %2232 = vmatmul.mubr.msk.f32.vlgmr.msra.gmra.mrb[0].mxu1 %vm755_vm1, %v832_v22  ;;  %p2667_p13 = scmp.ne.s32.totalorder %s3374_s1, %s2666_s25 }
 0x106   : > { %2247 = vmatprep.mubr.msk.f32.mxu1 %vm2808_vm0, %v2809_v1  ;;  %vm3283_vm4 = vcmp.ne.s32.totalorder %v1091_v41, 0  ;;  %v1702_v41 = vld [vmem:[%s3542_s10 + $0x8] sm:$0xff] }
 0x107   : > { %v2315_v42 = vpack.c.bf16 %v1702_v41, %v1701_v40 }
 0x108   : > { %2313 = vmatpush3.bf16.msra.mxu0 %v2312_v17 }
 0x109   : > { %2265 = vmatprep.subr.mxu0 %v2809_v1 }
 0x10b   : > { %2243 = vmatmul.mubr.msk.f32.vlgmr.msra.gmra.mrb[2].mxu0 %vm755_vm1, %v924_v18 }
 0x10c   : > { %2267 = vmatprep.mubr.msk.f32.mxu0 %vm2808_vm0, %v2809_v1 }
 0x1d6   : > { %v825_v24 = vpop.f32.mrb[0].mxu0 }
 0x1d7   : > { %v826_v25 = vadd.f32 %v2145_v23, %v825_v24  ;;  %v2222_v26 = vpop.f32.mrb[1].mxu0 }
 0x1d8   : > { %v913_v34 = vpop.f32.mrb[0].mxu1 }
 0x1d9   : > { %831 = vst.msk [vmem:[#allocation2] sm:$0xff] %vm755_vm1, %v826_v25  ;;  %v914_v35 = vadd.f32 %v2147_v33, %v913_v34  ;;  %v2233_v36 = vpop.f32.mrb[1].mxu1 }
 0x1db   : > { %918 = vst.msk [vmem:[#allocation3] sm:$0xff] %vm755_vm1, %v914_v35 }
 0x1de   : > { %v1006_v28 = vpop.f32.mrb[2].mxu0 }
 0x1df   : > { %v1007_v29 = vadd.f32 %v2149_v27, %v1006_v28  ;;  %v2244_v30 = vpop.f32.mrb[3].mxu0 }
 0x1e0   : > { %v921_v31 = vld [vmem:[#allocation2] sm:$0xff] }
 0x1e1   : > { %v1010_v32 = vmul.f32 0.35355338, %v1007_v29  ;;  %1181 = vrot.lane.b32.xlu1 %v921_v31, %s2810_s27  ;;  %2246 = vmatpush3.xpose.msk.msra.mxu1 %vm1012_vm2, %v921_v31 }
 0x1e2   : > { %2250 = vmatprep.subr.mxu1 %v2809_v1  ;;  %v3278_v37 = vld [vmem:[#allocation3] sm:$0xff] }
 0x1e4   : > { %2248 = vmatmul.mubr.msk.f32.vlgmr.msra.gmra.mrb[2].mxu1 %vm1012_vm2, %v1010_v32 }
 0x1e5   : > { %1179 = vrot.lane.b32.xlu1 %v1010_v32, %s2810_s27  ;;  %2252 = vmatprep.mubr.msk.f32.mxu1 %vm2808_vm0, %v2809_v1 }
 0x1e6   : > { %2251 = vmatpush3.msra.mxu1 %v3278_v37 }
 0x1e7   : > { %2255 = vmatprep.subr.mxu1 %v2809_v1 }
 0x1e9   : > { %1348 = vrot.lane.b32.xlu1 %v1010_v32, %s2811_s11 }
 0x1ed   : > { %1518 = vrot.lane.b32.xlu1 %v921_v31, %s2812_s13 }
 0x1f1   : > { %1516 = vrot.lane.b32.xlu1 %v1010_v32, %s2812_s13 }
 0x253   : > { %v1182_v52 = vpop.permute.xlu1 %1181 }
 0x257   : > { %v1180_v53 = vpop.permute.xlu1 %1179 }
 0x25b   : > { %v1349_v54 = vpop.permute.xlu1 %1348 }
 0x25f   : > { %v1519_v57 = vpop.permute.xlu1 %1518 }
 0x263   : > { %v1517_v59 = vpop.permute.xlu1 %1516 }
 0x2b7   : > { %v1085_v43 = vpop.f32.mrb[2].mxu1 }
 0x2b8   : > { %v1093_v44 = vsel %vm3283_vm4, -1e+09, %v1085_v43  ;;  %v2249_v45 = vpop.f32.mrb[3].mxu1  ;;  %v1703_v43 = vld [vmem:[%s3542_s10 + $0x10] sm:$0xff] }
 0x2b9   : > { %v1094_v46 = vsel %vm1012_vm2, %v1093_v44, -inf }
 0x2ba   : > { %1095 = vmax.xlane.f32.xlu0 %v1094_v46 }
 0x347   : > { %v1096_v47 = vpop.xlane.xlu0 %1095 }
 0x348   : > { %v1097_v48 = vsub.f32 %v1093_v44, %v1096_v47 }
 0x34a   : > { %v1098_v49 = vmul.f32 1.442695, %v1097_v48 }
 0x34c   : > { %2446 = vpow2.f32 %v1098_v49 }
 0x356   : > { %v2447_v50 = vpop.eup %2446 }
 0x357   : > { %v1100_v51 = vsel %vm1012_vm2, %v2447_v50, 0.0 }
 0x358   : > { %1101 = vadd.xlane.f32.xlu0 %v1100_v51 }
 0x36e   : > { %1350 = vrot.lane.b32.xlu0 %v921_v31, %s2811_s11 }
 0x3e5   : > { %v1102_v55 = vpop.xlane.xlu0 %1101 }
 0x3e6   : > { %2448 = vrcp.f32 %v1102_v55 }
 0x3e9   : > { %v1351_v56 = vpop.permute.xlu0 %1350 }
 0x3ea   : > { %2266 = vmatpush3.xpose.msk.msra.mxu0 %vm1012_vm2, %v1351_v56 }
 0x3eb   : > { %2275 = vmatprep.subr.mxu0 %v2809_v1 }
 0x3ed   : > { %2268 = vmatmul.mubr.msk.f32.vlgmr.msra.gmra.mrb[4].mxu0 %vm1012_vm2, %v1349_v54 }
 0x3ee   : > { %2276 = vmatpush3.xpose.msk.msra.mxu0 %vm1012_vm2, %v1519_v57  ;;  %2277 = vmatprep.mubr.msk.f32.mxu0 %vm2808_vm0, %v2809_v1 }
 0x3ef   : > { %2314 = vmatprep.subr.bf16.mxu0 %v2807_v0 }
 0x3f0   : > { %v2449_v58 = vpop.eup %2448 }
 0x3f1   : > { %v1104_v60 = vmul.f32 %v2449_v58, %v2447_v50  ;;  %2278 = vmatmul.mubr.msk.f32.vlgmr.msra.gmra.mrb[6].mxu0 %vm1012_vm2, %v1517_v59 }
 0x3f2   : > { %2293 = vmatprep.mubr.msk.f32.mxu0 %vm2808_vm0, %v2809_v1  ;;  %2316 = vmatpush3.bf16.msra.mxu0 %v2315_v42 }
 0x3f3   : > { %1105 = vst.msk [vmem:[%s3303_s21] sm:$0xff] %vm1012_vm2, %v1104_v60  ;;  %2253 = vmatmul.mubr.msk.f32.vlgmr.msra.gmra.mrb[4].mxu1 %vm1012_vm2, %v1104_v60  ;;  %2317 = vmatprep.subr.bf16.mxu0 %v2807_v0 }
 0x3f4   : > { %2256 = vmatpush3.xpose.msk.msra.mxu1 %vm1012_vm2, %v1182_v52  ;;  %2257 = vmatprep.mubr.msk.f32.mxu1 %vm2808_vm0, %v2809_v1 }
 0x3f5   : > { %2260 = vmatprep.subr.mxu1 %v2809_v1 }
 0x3f7   : > { %2258 = vmatmul.mubr.msk.f32.vlgmr.msra.gmra.mrb[6].mxu1 %vm1012_vm2, %v1180_v53 }
 0x3f8   : > { %2262 = vmatprep.mubr.msk.f32.mxu1 %vm2808_vm0, %v2809_v1 }
 0x4c0   : > { %v1422_v61 = vpop.f32.mrb[4].mxu0 }
 0x4c1   : > { %v1426_v62 = vsel %vm3283_vm4, -1e+09, %v1422_v61  ;;  %v2269_v63 = vpop.f32.mrb[5].mxu0 }
 0x4c2   : > { %v1427_v2 = vsel %vm1012_vm2, %v1426_v62, -inf }
 0x4c3   : > { %1428 = vmax.xlane.f32.xlu0 %v1427_v2 }
 0x4c4   : > { %v1590_v3 = vpop.f32.mrb[6].mxu0 }
 0x4c5   : > { %v2279_v4 = vpop.f32.mrb[7].mxu0  ;;  %v1594_v11 = vsel %vm3283_vm4, -1e+09, %v1590_v3 }
 0x4c6   : > { %v3318_v5 = vpop.f32.mrb[4].mxu1  ;;  %v1595_v12 = vsel %vm1012_vm2, %v1594_v11, -inf }
 0x4c7   : > { %v2254_v6 = vpop.f32.mrb[5].mxu1 }
 0x4ca   : > { %v1253_v7 = vpop.f32.mrb[6].mxu1 }
 0x4cb   : > { %v1257_v8 = vsel %vm3283_vm4, -1e+09, %v1253_v7  ;;  %v2259_v9 = vpop.f32.mrb[7].mxu1 }
 0x4cc   : > { %v1258_v10 = vsel %vm1012_vm2, %v1257_v8, -inf }
 0x4cd   : > { %1259 = vmax.xlane.f32.xlu1 %v1258_v10 }
 0x4d1   : > { %1596 = vmax.xlane.f32.xlu1 %v1595_v12 }
 0x550   : > { %v1429_v13 = vpop.xlane.xlu0 %1428 }
 0x551   : > { %v1430_v14 = vsub.f32 %v1426_v62, %v1429_v13 }
 0x553   : > { %v1431_v15 = vmul.f32 1.442695, %v1430_v14 }
 0x555   : > { %2450 = vpow2.f32 %v1431_v15 }
 0x55a   : > { %v1260_v16 = vpop.xlane.xlu1 %1259 }
 0x55b   : > { %v1261_v24 = vsub.f32 %v1257_v8, %v1260_v16 }
 0x55d   : > { %v1262_v25 = vmul.f32 1.442695, %v1261_v24 }
 0x55e   : > { %v1597_v17 = vpop.xlane.xlu1 %1596 }
 0x55f   : > { %v2451_v18 = vpop.eup %2450  ;;  %v1598_v19 = vsub.f32 %v1594_v11, %v1597_v17 }
 0x560   : > { %v1433_v20 = vsel %vm1012_vm2, %v2451_v18, 0.0 }
 0x561   : > { %v1599_v21 = vmul.f32 1.442695, %v1598_v19  ;;  %1434 = vadd.xlane.f32.xlu0 %v1433_v20 }
 0x563   : > { %2452 = vpow2.f32 %v1599_v21 }
 0x564   : > { %2454 = vpow2.f32 %v1262_v25 }
 0x56d   : > { %v2453_v22 = vpop.eup %2452 }
 0x56e   : > { %v1601_v23 = vsel %vm1012_vm2, %v2453_v22, 0.0  ;;  %v2455_v26 = vpop.eup %2454 }
 0x56f   : > { %1602 = vadd.xlane.f32.xlu1 %v1601_v23  ;;  %v1264_v27 = vsel %vm1012_vm2, %v2455_v26, 0.0 }
 0x577   : > { %1272 = vrot.lane.b32.xlu0 %v3278_v37, %s2810_s27  ;;  %s2816_s27 = smov 24  }
 0x580   : > { %1440 = vrot.lane.b32.xlu1 %v3278_v37, %s2811_s11  ;;  %s3544_s11 = sld [smem:[#allocation31_spill]] }
 0x586   : > { %p3546_p12 = scmp.ne.s32.totalorder %s3544_s11, 0 }
 0x588   : > { %p2668_p3 = pnand %p2667_p13, %p3546_p12 }
 0x58a   : > { %p2669_p0 = pneg %p2668_p3 }
 0x5a4   : > { %1265 = vadd.xlane.f32.xlu1 %v1264_v27 }
 0x5b5   : > { %1608 = vrot.lane.b32.xlu1 %v3278_v37, %s2812_s13  ;;  %s2175_s13 = sshll.u32 %s3543_s23, 9 }
 0x5b6   : > { %s3372_s15 = scalar_lea.hbm %s3545_s4, %s2175_s13 }
 0x5ee   : > { %v1435_v28 = vpop.xlane.xlu0 %1434 }
 0x5ef   : > { %2456 = vrcp.f32 %v1435_v28 }
 0x5f2   : > { %v1273_v29 = vpop.permute.xlu0 %1272 }
 0x5f3   : > { %2261 = vmatpush3.msra.mxu1 %v1273_v29 }
 0x5f4   : > { %2270 = vmatprep.subr.mxu1 %v2809_v1 }
 0x5f9   : > { %v2457_v30 = vpop.eup %2456 }
 0x5fa   : > { %v1437_v31 = vmul.f32 %v2457_v30, %v2451_v18 }
 0x5fc   : > { %2160 = vst.msk [vmem:[%s3303_s21 + $0x10] sm:$0xff] %vm1012_vm2, %v1437_v31  ;;  %v1603_v32 = vpop.xlane.xlu1 %1602 }
 0x5fd   : > { %2458 = vrcp.f32 %v1603_v32 }
 0x600   : > { %v1441_v35 = vpop.permute.xlu1 %1440 }
 0x607   : > { %v2459_v33 = vpop.eup %2458 }
 0x608   : > { %v1605_v34 = vmul.f32 %v2459_v33, %v2453_v22 }
 0x60a   : > { %2164 = vst.msk [vmem:[%s3303_s21 + $0x18] sm:$0xff] %vm1012_vm2, %v1605_v34 }
 0x631   : > { %v1266_v36 = vpop.xlane.xlu1 %1265 }
 0x632   : > { %2460 = vrcp.f32 %v1266_v36 }
 0x635   : > { %v1609_v39 = vpop.permute.xlu1 %1608 }
 0x63c   : > { %v2461_v37 = vpop.eup %2460 }
 0x63d   : > { %v1268_v38 = vmul.f32 %v2461_v37, %v2455_v26 }
 0x63f   : > { %2156 = vst.msk [vmem:[%s3303_s21 + $0x8] sm:$0xff] %vm1012_vm2, %v1268_v38  ;;  %2263 = vmatmul.mubr.msk.f32.vlgmr.msra.gmra.mrb[8].mxu1 %vm1012_vm2, %v1268_v38  ;;  %s2672_s21 = scalar_lea.vmem %s2671_s20, 1024 }
 0x640   : > { %2271 = vmatpush3.msra.mxu1 %v1441_v35  ;;  %2272 = vmatprep.mubr.msk.f32.mxu1 %vm2808_vm0, %v2809_v1  ;;  %p2674_p9 = scmp.lt.s32.totalorder %s2672_s21, %s2666_s25 }
 0x641   : > { %2280 = vmatprep.subr.mxu1 %v2809_v1 }
 0x642   : > { %p2675_p5 = por %p2674_p9, %p2673_p11 }
 0x643   : > { %2273 = vmatmul.mubr.msk.f32.vlgmr.msra.gmra.mrb[10].mxu1 %vm1012_vm2, %v1437_v31 }
 0x644   : > { %2281 = vmatpush3.msra.mxu1 %v1609_v39  ;;  %2282 = vmatprep.mubr.msk.f32.mxu1 %vm2808_vm0, %v2809_v1  ;;  %v1704_v1 = vld [vmem:[%s3542_s10 + $0x18] sm:$0xff]  ;;  %p2676_p7 = pnand %p2675_p5, %p2669_p0 }
 0x645   : > { %v2318_v44 = vpack.c.bf16 %v1704_v1, %v1703_v43 }
 0x647   : > { %2283 = vmatmul.mubr.msk.f32.vlgmr.msra.gmra.mrb[12].mxu1 %vm1012_vm2, %v1605_v34  ;;  %2319 = vmatpush3.bf16.msra.mxu0 %v2318_v44 }
 0x712   : > { %v1344_v45 = vpop.f32.mrb[8].mxu1 }
 0x713   : > { %1685 = vrot.lane.b32.xlu0 %v1344_v45, %s2814_s17  ;;  %v2264_v46 = vpop.f32.mrb[9].mxu1 }
 0x716   : > { %v1512_v47 = vpop.f32.mrb[10].mxu1 }
 0x717   : > { %1689 = vrot.lane.b32.xlu1 %v1512_v47, %s2815_s6  ;;  %v2274_v0 = vpop.f32.mrb[11].mxu1 }
 0x71a   : > { %v1680_v48 = vpop.f32.mrb[12].mxu1 }
 0x71b   : > { %1693 = vrot.lane.b32.xlu0 %v1680_v48, %s2816_s27  ;;  %v2284_v49 = vpop.f32.mrb[13].mxu1 }
 0x785   : > { %v1686_v50 = vpop.permute.xlu0 %1685 }
 0x786   : > { %v1696_v52 = vsel %vm1012_vm2, %v3318_v5, %v1686_v50 }
 0x789   : > { %v1690_v51 = vpop.permute.xlu1 %1689 }
 0x78a   : > { %v1698_v53 = vsel %vm1697_vm5, %v1696_v52, %v1690_v51 }
 0x78d   : > { %v1694_v54 = vpop.permute.xlu0 %1693 }
 0x78e   : > { %v1700_v55 = vsel %vm1699_vm6, %v1698_v53, %v1694_v54 }
 0x78f   : > { %2294 = vmatmul.mubr.msk.f32.vlgmr.msra.gmra.mrb[8].mxu0 %vm755_vm1, %v1700_v55 }
 0x790   : > { %2679 = shalt.err (!%p2676_p7)
}
 0x791   : > { %s2680_s5 = scalar_lea.hbm %s3372_s15, 512  ;;  %s2684_s16 = scalar_lea.hbm %s3545_s4, 1024 }
 0x792   : > { %p2681_p10 = scmp.ne.s32.totalorder %s3372_s15, %s2680_s5  ;;  %p2685_p4 = scmp.lt.u32.totalorder %s3372_s15, %s3545_s4 }
 0x793   : > { %p2686_p1 = scmp.lt.u32.totalorder %s2684_s16, %s2680_s5  ;;  %p2688_p13 = scmp.lt.u32.totalorder %s2680_s5, %s3372_s15 }
 0x794   : > { %p2682_p6 = pnand %p2681_p10, %p3546_p12 }
 0x795   : > { %p2687_p8 = por %p2686_p1, %p2685_p4 }
 0x796   : > { %p2683_p2 = pneg %p2682_p6 }
 0x797   : > { %p2689_p3 = por %p2688_p13, %p2687_p8 }
 0x799   : > { %p2690_p0 = pnand %p2689_p3, %p2683_p2 }
 0x79b   : > { %2693 = shalt.err (!%p2690_p0)
}
 0x79c   : > { %s2818_s13 = smov 128   ;;  %s3547_s25 = sld [smem:[#allocation39_spill]] }
 0x79d   : > { %2341 = dma.vmem_to_hbm [thread:$0]  (%p3546_p12), %s3374_s1, 512, %s3372_s15, %s1804_s18, %s2818_s13, %s2818_s13, %s2814_s17  }
 0x79e   : > { %s2170_s24 = sshll.u32 %s3543_s23, 7  ;;  %s713_s20 = scalar_lea.vmem [#allocation16], %s3200_s12 }
 0x79f   : > { %s1818_s21 = sshll.u32 %s713_s20, 4  ;;  %s3548_s14 = sld [smem:[#allocation40_spill]]  ;;  %s3411_s21 = int_to_ptr.vmem [resolvable:$true] %s1818_s21 }
 0x7a0   : > { %s1799_s17 = scalar_lea.sflag [#allocation6], %s3197_s28  ;;  %s2694_s1 = scalar_lea.vmem %s3411_s21, 128 }
 0x7a1   : > { %p2695_p11 = scmp.ne.s32.totalorder %s3411_s21, %s2694_s1  ;;  %s2819_s12 = smov [#allocation16]  }
 0x7a2   : > { %v2167_v56 = vld [vmem:[%s3547_s25] ss:$0 sm:$0xff]  ;;  %s2698_s23 = sshll.u32 %s2819_s12, 4  ;;  %s2699_s23 = int_to_ptr.vmem [resolvable:$false] %s2698_s23 }
 0x7a3   : > { %p2696_p9 = pnand %p2695_p11, %p3546_p12  ;;  %s2700_s15 = scalar_lea.vmem %s2699_s23, 256 }
 0x7a4   : > { %p2701_p7 = scmp.lt.s32.totalorder %s3411_s21, %s2699_s23  ;;  %p2702_p10 = scmp.lt.s32.totalorder %s2700_s15, %s2694_s1 }
 0x7a5   : > { %s3409_s16 = scalar_lea.hbm %s3548_s14, %s2170_s24  ;;  %p2697_p5 = pneg %p2696_p9 }
 0x7a6   : > { %p2703_p6 = por %p2702_p10, %p2701_p7 }
 0x7a8   : > { %p2704_p2 = pnand %p2703_p6, %p2697_p5 }
 0x862   : > { %v1774_v57 = vpop.f32.mrb[8].mxu0 }
 0x863   : > { %v1789_v58 = vadd.f32 %v2167_v56, %v1774_v57  ;;  %v2295_v59 = vpop.f32.mrb[9].mxu0 }
 0x865   : > { %1790 = vst.msk [vmem:[%s713_s20] sm:$0xff] %vm755_vm1, %v1789_v58 }
 0x866   : > { %2707 = shalt.err (!%p2704_p2)
}
 0x867   : > { %s2708_s28 = scalar_lea.hbm %s3409_s16, 128  ;;  %s2712_s27 = scalar_lea.hbm %s3548_s14, 256 }
 0x868   : > { %p2709_p4 = scmp.ne.s32.totalorder %s3409_s16, %s2708_s28  ;;  %p2713_p13 = scmp.lt.u32.totalorder %s3409_s16, %s3548_s14 }
 0x869   : > { %p2714_p3 = scmp.lt.u32.totalorder %s2712_s27, %s2708_s28  ;;  %p2716_p11 = scmp.lt.u32.totalorder %s2708_s28, %s3409_s16 }
 0x86a   : > { %p2710_p1 = pnand %p2709_p4, %p3546_p12 }
 0x86b   : > { %p2715_p0 = por %p2714_p3, %p2713_p13 }
 0x86c   : > { %p2711_p8 = pneg %p2710_p1 }
 0x86d   : > { %p2717_p9 = por %p2716_p11, %p2715_p0 }
 0x86f   : > { %p2718_p5 = pnand %p2717_p9, %p2711_p8 }
 0x871   : > { %2721 = shalt.err (!%p2718_p5)
}
 0x872   : > { %2340 = dma.vmem_to_hbm [thread:$0]  (%p3546_p12), %s3411_s21, 128, %s3409_s16, %s1799_s17  }
 0x873 PF: > { %s3549_s9 = sld [smem:[#allocation26_spill]]  ;;  %s3550_s25 = sld [smem:[#allocation29_spill]] }
 0x874   : > { %p3552_p10 = scmp.ge.s32.totalorder %s2796_s30, 2 }
 0x879   : > { %s1849_s24 = sand.u32 1, %s3549_s9   ;;  %p3551_p7 = scmp.ne.s32.totalorder %s3550_s25, 0 }
 0x87a   : > { %s1850_s20 = scalar_lea.sflag [#allocation6], %s1849_s24 }
 0x87b   : > { %p2368_p6 = pnand %p3552_p10, %p3551_p7 }
 0x87d   : > { %2767 = dma.done.wait (!%p2368_p6), %s1850_s20, 128  }
 0x87e   : > { %2769 = vsyncadd (!%p2368_p6), %s1850_s20, 4294967168  ;;  %s1859_s5 = scalar_lea.sflag [#allocation18], %s1849_s24 }
 0x87f   : > { %2771 = dma.done.wait (!%p2368_p6), %s1859_s5, 512  }
 0x880   : > { %2773 = vsyncadd (!%p2368_p6), %s1859_s5, 4294966784  ;;  %s40_s30 = sadd.s32 1, %s2796_s30   ;;  %s3553_s11 = sld [smem:[#allocation27_spill]] }
 0x881   : > { %p37_p2 = scmp.ge.s32.totalorder %s40_s30, 4   ;;  %s3554_s27 = sld [smem:[#allocation32_spill]] }
 0x882   : > { %s3555_s21 = sld [smem:[#allocation30_spill]]  ;;  %s3556_s25 = smov %s2780_s26 }
 0x883   : > { %s3558_s28 = smov %s2792_s29  ;;  %39 = sbr.rel (!%p37_p2) target bundleno = 23 (0x17), region = 213 }
 0x886   : > { %s3557_s26 = smov %s3553_s11 }
 0x888   : > { %s3559_s29 = smov %s3555_s21 }
 0x88a   :  { %1864 = vsyncpa [#allocation5], 1 }
 0x88b   :  { %1866 = vsyncpa [#allocation5 + $0x1], 1 }
 0x88c   :  { %1867 = vsyncpa [#allocation8], 1 }
 0x88d   :  { %1869 = vsyncpa [#allocation8 + $0x1], 1 }
 0x88e   :  { %1870 = vsyncpa [#allocation11], 1 }
 0x88f   :  { %1872 = vsyncpa [#allocation11 + $0x1], 1 }
 0x890   :  { %1873 = vsyncpa [#allocation14], 1 }
 0x891   :  { %1874 = vsyncpa [#allocation6], 1 }
 0x892   :  { %1876 = vsyncpa [#allocation6 + $0x1], 1 }
 0x893   :  { %1877 = vsyncpa [#allocation18], 1 }
 0x894   :  { %1879 = vsyncpa [#allocation18 + $0x1], 1 }

</bundles_post_ra>
